<compile_context>
chip_gen: v6e
topology: v6e:2x2x1
jax: 0.10.0
libtpu: 0.0.40
codegen_flags: <defaults>
</compile_context>

<pallas_src>
import functools

import numpy as np
import jax
import jax.numpy as jnp
from jax import lax
from jax.experimental import pallas as pl
from jax.experimental.pallas import tpu as pltpu

# ----------------------------- config ---------------------------------------
SR = 1600                      # small "sample rate" for the synthetic test
FRAME_SHIFT = int(SR * 0.010)  # 10 ms  -> 16 samples
FRAME_LEN = int(SR * 0.025)    # 25 ms  -> 40 samples
FRAME_LEN_PAD = 128            # contraction dim padded to a full lane width
NFFT = 128
NBINS = NFFT // 2 + 1          # 65
NBINS_PAD = 128                # padded to a full lane dim (also the padded mel out dim)
NUM_MEL = 32
TARGET_LEN = 64                # frames after pad/trim (real model: 1024)
PATCH = 16
EMBED = 128                    # real model: 768
HEADS = 4
DEPTH = 2                      # real model: 12
MLP_RATIO = 4
HIDDEN = MLP_RATIO * EMBED     # 512
NUM_PATCHES = (TARGET_LEN // PATCH) * (NUM_MEL // PATCH)  # 4 * 2 = 8
NORM_MEAN = -5.081
NORM_STD = 4.4849
LN_EPS = 1e-6

# packed small-params row indices (each row zero-padded to HIDDEN lanes)
SMALL_ROWS = 16
(R_LN1_G, R_LN1_B, R_QKV_B, R_PROJ_B, R_LN2_G, R_LN2_B,
 R_FC1_B, R_FC2_B, R_NORM_G, R_NORM_B) = range(10)


# -------------------- fixed DSP constants (deterministic) -------------------
def _mel_filterbank(num_mels, nfft, sr, fmin=20.0):
    def hz2mel(f):
        return 2595.0 * np.log10(1.0 + f / 700.0)

    def mel2hz(m):
        return 700.0 * (10.0 ** (m / 2595.0) - 1.0)

    fmax = sr / 2.0
    mpts = np.linspace(hz2mel(fmin), hz2mel(fmax), num_mels + 2)
    hz = mel2hz(mpts)
    bin_f = np.floor((nfft + 1) * hz / sr).astype(np.int64)
    fb = np.zeros((nfft // 2 + 1, num_mels), dtype=np.float32)
    for m in range(1, num_mels + 1):
        l, c, r = bin_f[m - 1], bin_f[m], bin_f[m + 1]
        for k in range(l, c):
            fb[k, m - 1] = (k - l) / max(c - l, 1)
        for k in range(c, r):
            fb[k, m - 1] = (r - k) / max(r - c, 1)
    return fb


_n = np.arange(FRAME_LEN)
_win = np.zeros((1, FRAME_LEN_PAD), np.float32)
_win[0, :FRAME_LEN] = 0.5 - 0.5 * np.cos(2.0 * np.pi * _n / (FRAME_LEN - 1))
WIN = jnp.asarray(_win)                                    # (1, 128)

_k = np.arange(NBINS)
_ang = 2.0 * np.pi * np.outer(_n, _k) / NFFT
# pad DFT matrices: rows 40 -> 128 (K dim), cols 65 -> 128 (lane dim)
_cos = np.zeros((FRAME_LEN_PAD, NBINS_PAD), np.float32)
_cos[:FRAME_LEN, :NBINS] = np.cos(_ang)
_sin = np.zeros((FRAME_LEN_PAD, NBINS_PAD), np.float32)
_sin[:FRAME_LEN, :NBINS] = -np.sin(_ang)
COS = jnp.asarray(_cos)                                    # (128, 128)
SIN = jnp.asarray(_sin)                                    # (128, 128)
# mel matrix padded on BOTH axes so the kernel's output store is lane-dense (128 wide)
_melfb = np.zeros((NBINS_PAD, NBINS_PAD), np.float32)
_melfb[:NBINS, :NUM_MEL] = _mel_filterbank(NUM_MEL, NFFT, SR)
MELFB = jnp.asarray(_melfb)                                # (128, 128)


# ----------------------------- in-kernel helpers ------------------------------
def _gelu(x):
    # tanh approximation of GELU (EUP-friendly); kept in f32 (portable to v5e)
    return 0.5 * x * (1.0 + jnp.tanh(0.7978845608028654 * (x + 0.044715 * x * x * x)))


def _ln(x, g, b, eps=LN_EPS):
    mu = jnp.mean(x, axis=-1, keepdims=True)
    xc = x - mu
    var = jnp.mean(xc * xc, axis=-1, keepdims=True)
    return xc * lax.rsqrt(var + eps) * g + b


# ----------------------------- Pallas kernels --------------------------------
def fbank_kernel(frames_ref, win_ref, cos_ref, sin_ref, mel_ref, o_ref):
    """All B*T frame rows at once: windowed DFT power -> mel -> log -> normalize."""
    f = frames_ref[...] * win_ref[...]                                  # (B*T, 128)
    re = jnp.dot(f, cos_ref[...], preferred_element_type=jnp.float32)  # (B*T, 128)
    im = jnp.dot(f, sin_ref[...], preferred_element_type=jnp.float32)
    power = re * re + im * im
    mel = jnp.dot(power, mel_ref[...], preferred_element_type=jnp.float32)
    fb = jnp.log(jnp.maximum(mel, 1e-10))
    o_ref[...] = (fb - NORM_MEAN) * (1.0 / NORM_STD)                    # lane-dense store


def fused_encoder_kernel(patches_ref, pw_ref, padd_ref,
                         qkv_w_ref, proj_w_ref, fc1_w_ref, fc2_w_ref, sp_ref,
                         o_ref, attn_ref, *, heads, batch, seq):
    """Whole encoder; grid axis 0 = layer index ('arbitrary').  o_ref is the VMEM-resident
    (B*S, D) activation carrier (its block index is constant across the layer axis)."""
    l = pl.program_id(0)
    d = o_ref.shape[-1]
    dh = d // heads
    scale = dh ** -0.5
    bs = batch * seq

    # ---- layer-0 prologue: patch-embed conv-as-matmul + (bias + pos + modality) ----
    @pl.when(l == 0)
    def _():
        y = jnp.dot(patches_ref[...].astype(jnp.bfloat16), pw_ref[...],
                    preferred_element_type=jnp.float32)                 # (B*P, D)
        y = y.reshape(batch, seq, d) + padd_ref[...]                    # broadcast (P, D)
        o_ref[...] = y.reshape(bs, d)

    # ---- unpack this layer's small params (one packed (16, HIDDEN) block) ----
    sp = sp_ref[0]
    ln1_g = sp[R_LN1_G:R_LN1_G + 1, 0:d]
    ln1_b = sp[R_LN1_B:R_LN1_B + 1, 0:d]
    qkv_b = sp[R_QKV_B:R_QKV_B + 1, 0:3 * d]
    proj_b = sp[R_PROJ_B:R_PROJ_B + 1, 0:d]
    ln2_g = sp[R_LN2_G:R_LN2_G + 1, 0:d]
    ln2_b = sp[R_LN2_B:R_LN2_B + 1, 0:d]
    fc1_b = sp[R_FC1_B:R_FC1_B + 1, :]
    fc2_b = sp[R_FC2_B:R_FC2_B + 1, 0:d]
    norm_g = sp[R_NORM_G:R_NORM_G + 1, 0:d]
    norm_b = sp[R_NORM_B:R_NORM_B + 1, 0:d]

    x = o_ref[...]                                                      # (B*S, D) f32

    # ---- attention branch: LN1 -> QKV -> per-head batched MHSA -> proj + residual ----
    h1 = _ln(x, ln1_g, ln1_b)
    qkv = jnp.dot(h1.astype(jnp.bfloat16), qkv_w_ref[0],
                  preferred_element_type=jnp.float32) + qkv_b           # (B*S, 3D)
    qkv3 = qkv.reshape(batch, seq, 3 * d)
    q = qkv3[:, :, 0:d] * scale            # pre-scale q: O(S*D) instead of O(S^2)
    k = qkv3[:, :, d:2 * d]
    v = qkv3[:, :, 2 * d:3 * d]
    for h in range(heads):                 # static unroll; each head writes the scratch
        lo, hi = h * dh, (h + 1) * dh
        qh = q[:, :, lo:hi].astype(jnp.bfloat16)
        kh = k[:, :, lo:hi].astype(jnp.bfloat16)
        vh = v[:, :, lo:hi].astype(jnp.bfloat16)
        sc = jnp.einsum('bqd,bkd->bqk', qh, kh,
                        preferred_element_type=jnp.float32)             # (B, S, S)
        sc = sc - jnp.max(sc, axis=-1, keepdims=True)
        p = jnp.exp(sc)
        p = p * pl.reciprocal(jnp.sum(p, axis=-1, keepdims=True), approx=True)
        attn_ref[:, :, lo:hi] = jnp.einsum('bqk,bkd->bqd',
                                           p.astype(jnp.bfloat16), vh,
                                           preferred_element_type=jnp.float32)
    a = attn_ref[...].reshape(bs, d)
    a = jnp.dot(a.astype(jnp.bfloat16), proj_w_ref[0],
                preferred_element_type=jnp.float32) + proj_b
    x = x + a                                                           # residual

    # ---- MLP branch: LN2 -> fc1 + GELU -> fc2 + residual ----
    h2 = _ln(x, ln2_g, ln2_b)
    m = jnp.dot(h2.astype(jnp.bfloat16), fc1_w_ref[0],
                preferred_element_type=jnp.float32) + fc1_b
    m = _gelu(m)
    m = jnp.dot(m.astype(jnp.bfloat16), fc2_w_ref[0],
                preferred_element_type=jnp.float32) + fc2_b
    x = x + m

    o_ref[...] = x

    # ---- final encoder LayerNorm fused onto the last layer ----
    @pl.when(l == pl.num_programs(0) - 1)
    def _():
        o_ref[...] = _ln(x, norm_g, norm_b)


# ----------------------------- pallas_call wrappers ---------------------------
def wav2fbank_batch(audio):
    """audio: (B, 1, N) -> normalized fbanks (B, TARGET_LEN, NUM_MEL), one pallas_call."""
    b = audio.shape[0]
    a = audio - jnp.mean(audio, axis=(1, 2), keepdims=True)   # per-sound DC removal
    sig = a[:, 0, :]
    n = sig.shape[-1]
    n_frames = 1 + (n - FRAME_LEN) // FRAME_SHIFT
    idx = np.arange(n_frames)[:, None] * FRAME_SHIFT + np.arange(FRAME_LEN)[None, :]
    frames = jnp.take(sig, jnp.asarray(idx), axis=1)          # (B, F, L)  glue gather
    if n_frames < TARGET_LEN:
        frames = jnp.pad(frames, ((0, 0), (0, TARGET_LEN - n_frames), (0, 0)))
    elif n_frames > TARGET_LEN:
        frames = frames[:, :TARGET_LEN]
    n_valid = min(n_frames, TARGET_LEN)
    # pad contraction dim 40 -> 128 lanes and fold batch into rows (B*T, 128)
    frames = jnp.pad(frames, ((0, 0), (0, 0), (0, FRAME_LEN_PAD - FRAME_LEN)))
    frames = frames.reshape(b * TARGET_LEN, FRAME_LEN_PAD)
    rows = b * TARGET_LEN

    fb = pl.pallas_call(
        fbank_kernel,
        grid=(1,),
        in_specs=[pl.BlockSpec((rows, FRAME_LEN_PAD), lambda i: (0, 0)),
                  pl.BlockSpec((1, FRAME_LEN_PAD), lambda i: (0, 0)),
                  pl.BlockSpec((FRAME_LEN_PAD, NBINS_PAD), lambda i: (0, 0)),
                  pl.BlockSpec((FRAME_LEN_PAD, NBINS_PAD), lambda i: (0, 0)),
                  pl.BlockSpec((NBINS_PAD, NBINS_PAD), lambda i: (0, 0))],
        out_specs=pl.BlockSpec((rows, NBINS_PAD), lambda i: (0, 0)),
        out_shape=jax.ShapeDtypeStruct((rows, NBINS_PAD), jnp.float32),
        compiler_params=pltpu.CompilerParams(dimension_semantics=("arbitrary",)),
    )(frames, WIN, COS, SIN, MELFB)

    fb = fb.reshape(b, TARGET_LEN, NBINS_PAD)[:, :, :NUM_MEL]
    if n_valid < TARGET_LEN:
        # ZeroPad2d-on-fbank semantics: padded frame rows are zero BEFORE normalization
        fb = fb.at[:, n_valid:, :].set((0.0 - NORM_MEAN) / NORM_STD)
    return fb


def encoder_forward(params, fbanks):
    """(B, T, M) fbanks -> (B, P, D) tokens; single fused pallas_call over all layers."""
    b, t, m = fbanks.shape
    nh, nw = t // PATCH, m // PATCH
    p = nh * nw
    bs = b * p
    d = EMBED
    hid = HIDDEN
    patches = (fbanks.reshape(b, nh, PATCH, nw, PATCH)
               .transpose(0, 1, 3, 2, 4)
               .reshape(bs, PATCH * PATCH))                   # (B*P, 256) glue reshape

    kernel = functools.partial(fused_encoder_kernel, heads=HEADS, batch=b, seq=p)
    out = pl.pallas_call(
        kernel,
        grid=(DEPTH,),
        in_specs=[
            pl.BlockSpec((bs, PATCH * PATCH), lambda l: (0, 0)),       # patches (const)
            pl.BlockSpec((PATCH * PATCH, d), lambda l: (0, 0)),        # patch_w  (const)
            pl.BlockSpec((p, d), lambda l: (0, 0)),                    # patch_add (const)
            pl.BlockSpec((1, d, 3 * d), lambda l: (l, 0, 0)),          # qkv_w  (per layer)
            pl.BlockSpec((1, d, d), lambda l: (l, 0, 0)),              # proj_w (per layer)
            pl.BlockSpec((1, d, hid), lambda l: (l, 0, 0)),            # fc1_w  (per layer)
            pl.BlockSpec((1, hid, d), lambda l: (l, 0, 0)),            # fc2_w  (per layer)
            pl.BlockSpec((1, SMALL_ROWS, hid), lambda l: (l, 0, 0)),   # packed small params
        ],
        out_specs=pl.BlockSpec((bs, d), lambda l: (0, 0)),             # resident carrier
        out_shape=jax.ShapeDtypeStruct((bs, d), jnp.float32),
        scratch_shapes=[pltpu.VMEM((b, p, d), jnp.float32)],           # per-head attn out
        compiler_params=pltpu.CompilerParams(
            dimension_semantics=("arbitrary",),
            vmem_limit_bytes=48 * 1024 * 1024),
    )(patches, params["patch_w"], params["patch_add"],
      params["qkv_w"], params["proj_w"], params["fc1_w"], params["fc2_w"],
      params["small"])
    return out.reshape(b, p, d)


# ----------------------------- params ----------------------------------------
def _pack_small(ln1_g, ln1_b, qkv_b, proj_b, ln2_g, ln2_b, fc1_b, fc2_b, norm_g, norm_b):
    vals = [ln1_g, ln1_b, qkv_b, proj_b, ln2_g, ln2_b, fc1_b, fc2_b, norm_g, norm_b]
    rows = [jnp.pad(v.astype(jnp.float32), (0, HIDDEN - v.shape[0]))[None, :] for v in vals]
    rows.append(jnp.zeros((SMALL_ROWS - len(vals), HIDDEN), jnp.float32))
    return jnp.concatenate(rows, axis=0)                     # (16, HIDDEN)


def init_params(key):
    std = 0.02
    d = EMBED
    hid = HIDDEN
    ks = jax.random.split(key, 4 + 4 * DEPTH)

    def rnd(k, shape, dtype=jnp.float32):
        return (jax.random.normal(k, shape) * std).astype(dtype)

    patch_w = rnd(ks[0], (PATCH * PATCH, d), jnp.bfloat16)
    patch_b = jnp.zeros((d,), jnp.float32)
    pos_embed = rnd(ks[1], (NUM_PATCHES, d))
    modality_a = rnd(ks[2], (1, d))
    norm_g = jnp.ones((d,), jnp.float32)
    norm_b = jnp.zeros((d,), jnp.float32)
    # fold conv bias + positional embedding + modality token into one additive (P, D) term
    patch_add = (patch_b[None, :] + pos_embed + modality_a).astype(jnp.float32)

    qkv_w, proj_w, fc1_w, fc2_w, small = [], [], [], [], []
    for i in range(DEPTH):
        k0, k1, k2, k3 = ks[4 + 4 * i: 8 + 4 * i]
        qkv_w.append(rnd(k0, (d, 3 * d), jnp.bfloat16))
        proj_w.append(rnd(k1, (d, d), jnp.bfloat16))
        fc1_w.append(rnd(k2, (d, hid), jnp.bfloat16))
        fc2_w.append(rnd(k3, (hid, d), jnp.bfloat16))
        small.append(_pack_small(
            ln1_g=jnp.ones((d,)), ln1_b=jnp.zeros((d,)),
            qkv_b=jnp.zeros((3 * d,)), proj_b=jnp.zeros((d,)),
            ln2_g=jnp.ones((d,)), ln2_b=jnp.zeros((d,)),
            fc1_b=jnp.zeros((hid,)), fc2_b=jnp.zeros((d,)),
            norm_g=norm_g, norm_b=norm_b))
    return {
        "patch_w": patch_w,
        "patch_add": patch_add,
        "qkv_w": jnp.stack(qkv_w),      # (DEPTH, D, 3D)  bf16
        "proj_w": jnp.stack(proj_w),    # (DEPTH, D, D)   bf16
        "fc1_w": jnp.stack(fc1_w),      # (DEPTH, D, 4D)  bf16
        "fc2_w": jnp.stack(fc2_w),      # (DEPTH, 4D, D)  bf16
        "small": jnp.stack(small),      # (DEPTH, 16, 4D) f32
    }


# ----------------------------- model glue ------------------------------------
def cavmae_forward(params, audio):
    """audio: (n_sounds, 1, n_samples) in [-1, 1] -> (n_sounds, EMBED, NUM_PATCHES)."""
    fbanks = wav2fbank_batch(audio)                 # (B, T, M)   1 pallas_call
    x = encoder_forward(params, fbanks)             # (B, P, D)   1 fused pallas_call
    return jnp.transpose(x, (0, 2, 1))              # (B, EMBED, P) final XLA transpose


# ----------------------------- test ------------------------------------------
if __name__ == "__main__":
    key = jax.random.PRNGKey(0)
    pkey, akey = jax.random.split(key)
    params = init_params(pkey)

    n_samples = 1000  # -> 61 frames, zero-padded to TARGET_LEN=64 (pad branch exercised)
    audio = jax.random.uniform(akey, (2, 1, n_samples), jnp.float32, -1.0, 1.0)

    fwd = jax.jit(cavmae_forward)
    out = jax.block_until_ready(fwd(params, audio))

    assert out.shape == (2, EMBED, NUM_PATCHES), out.shape
    assert out.dtype == jnp.float32
    assert bool(jnp.all(jnp.isfinite(out)))
    print("KERNEL_OK")
</pallas_src>

<mosaic_0001>
module attributes {stable_mosaic.version = 11 : i64} {
  func.func @fbank_kernel(%arg0: i32, %arg1: memref<128x128xf32, #tpu.memory_space<vmem>>, %arg2: memref<1x128xf32, #tpu.memory_space<vmem>>, %arg3: memref<128x128xf32, #tpu.memory_space<vmem>>, %arg4: memref<128x128xf32, #tpu.memory_space<vmem>>, %arg5: memref<128x128xf32, #tpu.memory_space<vmem>>, %arg6: memref<128x128xf32, #tpu.memory_space<vmem>>) attributes {dimension_semantics = [#tpu.dimension_semantics<arbitrary>], iteration_bounds = array<i64: 1>, scalar_prefetch = 0 : i64, scratch_operands = 0 : i64, tpu.core_type = #tpu.core_type<tc>, window_params = [{pipeline_mode = #tpu.pipeline_mode<synchronous>, transform_indices = @transform_0, window_bounds = array<i64: 128, 128>}, {pipeline_mode = #tpu.pipeline_mode<synchronous>, transform_indices = @transform_1, window_bounds = array<i64: 1, 128>}, {pipeline_mode = #tpu.pipeline_mode<synchronous>, transform_indices = @transform_2, window_bounds = array<i64: 128, 128>}, {pipeline_mode = #tpu.pipeline_mode<synchronous>, transform_indices = @transform_3, window_bounds = array<i64: 128, 128>}, {pipeline_mode = #tpu.pipeline_mode<synchronous>, transform_indices = @transform_4, window_bounds = array<i64: 128, 128>}, {pipeline_mode = #tpu.pipeline_mode<synchronous>, transform_indices = @transform_5, window_bounds = array<i64: 128, 128>}]} {
    %c0 = arith.constant 0 : index
    %c0_0 = arith.constant 0 : index
    %0 = vector.load %arg1[%c0, %c0_0] : memref<128x128xf32, #tpu.memory_space<vmem>>, vector<128x128xf32>
    %c0_1 = arith.constant 0 : index
    %c0_2 = arith.constant 0 : index
    %1 = vector.load %arg2[%c0_1, %c0_2] : memref<1x128xf32, #tpu.memory_space<vmem>>, vector<1x128xf32>
    %2 = vector.broadcast %1 : vector<1x128xf32> to vector<128x128xf32>
    %3 = arith.mulf %0, %2 : vector<128x128xf32>
    %c0_3 = arith.constant 0 : index
    %c0_4 = arith.constant 0 : index
    %4 = vector.load %arg3[%c0_3, %c0_4] : memref<128x128xf32, #tpu.memory_space<vmem>>, vector<128x128xf32>
    %cst = arith.constant dense<0.000000e+00> : vector<128x128xf32>
    %5 = tpu.matmul %3, %4, %cst {dimension_numbers = #tpu.dot_dimension_numbers<[1], [0], [0], [1], [0, 0, 1, 1], [], []>} : vector<128x128xf32>, vector<128x128xf32>, vector<128x128xf32> -> vector<128x128xf32>
    %c0_5 = arith.constant 0 : index
    %c0_6 = arith.constant 0 : index
    %6 = vector.load %arg4[%c0_5, %c0_6] : memref<128x128xf32, #tpu.memory_space<vmem>>, vector<128x128xf32>
    %cst_7 = arith.constant dense<0.000000e+00> : vector<128x128xf32>
    %7 = tpu.matmul %3, %6, %cst_7 {dimension_numbers = #tpu.dot_dimension_numbers<[1], [0], [0], [1], [0, 0, 1, 1], [], []>} : vector<128x128xf32>, vector<128x128xf32>, vector<128x128xf32> -> vector<128x128xf32>
    %8 = arith.mulf %5, %5 : vector<128x128xf32>
    %9 = arith.mulf %7, %7 : vector<128x128xf32>
    %10 = arith.addf %8, %9 : vector<128x128xf32>
    %c0_8 = arith.constant 0 : index
    %c0_9 = arith.constant 0 : index
    %11 = vector.load %arg5[%c0_8, %c0_9] : memref<128x128xf32, #tpu.memory_space<vmem>>, vector<128x128xf32>
    %cst_10 = arith.constant dense<0.000000e+00> : vector<128x128xf32>
    %12 = tpu.matmul %10, %11, %cst_10 {dimension_numbers = #tpu.dot_dimension_numbers<[1], [0], [0], [1], [0, 0, 1, 1], [], []>} : vector<128x128xf32>, vector<128x128xf32>, vector<128x128xf32> -> vector<128x128xf32>
    %cst_11 = arith.constant 1.000000e-10 : f32
    %13 = vector.broadcast %cst_11 : f32 to vector<128x128xf32>
    %14 = arith.maximumf %12, %13 : vector<128x128xf32>
    %15 = math.log %14 : vector<128x128xf32>
    %cst_12 = arith.constant -5.081000e+00 : f32
    %16 = vector.broadcast %cst_12 : f32 to vector<128x128xf32>
    %17 = arith.subf %15, %16 : vector<128x128xf32>
    %cst_13 = arith.constant 0.222970411 : f32
    %18 = vector.broadcast %cst_13 : f32 to vector<128x128xf32>
    %19 = arith.mulf %17, %18 : vector<128x128xf32>
    %c0_14 = arith.constant 0 : index
    %c0_15 = arith.constant 0 : index
    %20 = vector.load %arg6[%c0_14, %c0_15] : memref<128x128xf32, #tpu.memory_space<vmem>>, vector<128x128xf32>
    tpu.vector_store %arg6[%c0_14, %c0_15], %19 {strides = array<i32>} : memref<128x128xf32, #tpu.memory_space<vmem>>, vector<128x128xf32>,
    return
  }
  func.func @transform_0(%arg0: i32) -> (i32, i32) {
    %c0_i32 = arith.constant 0 : i32
    %c0_i32_0 = arith.constant 0 : i32
    %c0_i32_1 = arith.constant 0 : i32
    return %c0_i32, %c0_i32_0 : i32, i32
  }
  func.func @transform_1(%arg0: i32) -> (i32, i32) {
    %c0_i32 = arith.constant 0 : i32
    %c0_i32_0 = arith.constant 0 : i32
    %c0_i32_1 = arith.constant 0 : i32
    return %c0_i32, %c0_i32_0 : i32, i32
  }
  func.func @transform_2(%arg0: i32) -> (i32, i32) {
    %c0_i32 = arith.constant 0 : i32
    %c0_i32_0 = arith.constant 0 : i32
    %c0_i32_1 = arith.constant 0 : i32
    return %c0_i32, %c0_i32_0 : i32, i32
  }
  func.func @transform_3(%arg0: i32) -> (i32, i32) {
    %c0_i32 = arith.constant 0 : i32
    %c0_i32_0 = arith.constant 0 : i32
    %c0_i32_1 = arith.constant 0 : i32
    return %c0_i32, %c0_i32_0 : i32, i32
  }
  func.func @transform_4(%arg0: i32) -> (i32, i32) {
    %c0_i32 = arith.constant 0 : i32
    %c0_i32_0 = arith.constant 0 : i32
    %c0_i32_1 = arith.constant 0 : i32
    return %c0_i32, %c0_i32_0 : i32, i32
  }
  func.func @transform_5(%arg0: i32) -> (i32, i32) {
    %c0_i32 = arith.constant 0 : i32
    %c0_i32_0 = arith.constant 0 : i32
    %c0_i32_1 = arith.constant 0 : i32
    return %c0_i32, %c0_i32_0 : i32, i32
  }
}

module attributes {stable_mosaic.version = 11 : i64} {
  func.func @fused_encoder_kernel(%arg0: i32, %arg1: memref<16x256xf32, #tpu.memory_space<vmem>>, %arg2: memref<256x128xbf16, #tpu.memory_space<vmem>>, %arg3: memref<8x128xf32, #tpu.memory_space<vmem>>, %arg4: memref<1x128x384xbf16, #tpu.memory_space<vmem>>, %arg5: memref<1x128x128xbf16, #tpu.memory_space<vmem>>, %arg6: memref<1x128x512xbf16, #tpu.memory_space<vmem>>, %arg7: memref<1x512x128xbf16, #tpu.memory_space<vmem>>, %arg8: memref<1x16x512xf32, #tpu.memory_space<vmem>>, %arg9: memref<16x128xf32, #tpu.memory_space<vmem>>, %arg10: memref<2x8x128xf32, #tpu.memory_space<vmem>>) attributes {dimension_semantics = [#tpu.dimension_semantics<arbitrary>], iteration_bounds = array<i64: 2>, scalar_prefetch = 0 : i64, scratch_operands = 1 : i64, tpu.core_type = #tpu.core_type<tc>, window_params = [{pipeline_mode = #tpu.pipeline_mode<synchronous>, transform_indices = @transform_0, window_bounds = array<i64: 16, 256>}, {pipeline_mode = #tpu.pipeline_mode<synchronous>, transform_indices = @transform_1, window_bounds = array<i64: 256, 128>}, {pipeline_mode = #tpu.pipeline_mode<synchronous>, transform_indices = @transform_2, window_bounds = array<i64: 8, 128>}, {transform_indices = @transform_3, window_bounds = array<i64: 1, 128, 384>}, {transform_indices = @transform_4, window_bounds = array<i64: 1, 128, 128>}, {transform_indices = @transform_5, window_bounds = array<i64: 1, 128, 512>}, {transform_indices = @transform_6, window_bounds = array<i64: 1, 512, 128>}, {transform_indices = @transform_7, window_bounds = array<i64: 1, 16, 512>}, {pipeline_mode = #tpu.pipeline_mode<synchronous>, transform_indices = @transform_8, window_bounds = array<i64: 16, 128>}]} {
    %c0_i32 = arith.constant 0 : i32
    %0 = arith.cmpi eq, %arg0, %c0_i32 : i32
    %1 = arith.extui %0 : i1 to i32
    %c0_i32_0 = arith.constant 0 : i32
    %2 = arith.cmpi ne, %1, %c0_i32_0 : i32
    scf.if %2 {
      %c0_66 = arith.constant 0 : index
      %c0_67 = arith.constant 0 : index
      %187 = vector.load %arg1[%c0_66, %c0_67] : memref<16x256xf32, #tpu.memory_space<vmem>>, vector<16x256xf32>
      %188 = arith.truncf %187 : vector<16x256xf32> to vector<16x256xbf16>
      %c0_68 = arith.constant 0 : index
      %c0_69 = arith.constant 0 : index
      %189 = vector.load %arg2[%c0_68, %c0_69] : memref<256x128xbf16, #tpu.memory_space<vmem>>, vector<256x128xbf16>
      %cst_70 = arith.constant dense<0.000000e+00> : vector<16x128xf32>
      %190 = tpu.matmul %188, %189, %cst_70 {dimension_numbers = #tpu.dot_dimension_numbers<[1], [0], [0], [1], [0, 0, 1, 1], [], []>} : vector<16x256xbf16>, vector<256x128xbf16>, vector<16x128xf32> -> vector<16x128xf32>
      %191 = vector.shape_cast %190 : vector<16x128xf32> to vector<2x8x128xf32>
      %c0_71 = arith.constant 0 : index
      %c0_72 = arith.constant 0 : index
      %192 = vector.load %arg3[%c0_71, %c0_72] : memref<8x128xf32, #tpu.memory_space<vmem>>, vector<8x128xf32>
      %193 = vector.shape_cast %192 : vector<8x128xf32> to vector<1x8x128xf32>
      %194 = vector.broadcast %193 : vector<1x8x128xf32> to vector<2x8x128xf32>
      %195 = arith.addf %191, %194 : vector<2x8x128xf32>
      %196 = vector.shape_cast %195 : vector<2x8x128xf32> to vector<16x128xf32>
      %c0_73 = arith.constant 0 : index
      %c0_74 = arith.constant 0 : index
      %197 = vector.load %arg9[%c0_73, %c0_74] : memref<16x128xf32, #tpu.memory_space<vmem>>, vector<16x128xf32>
      tpu.vector_store %arg9[%c0_73, %c0_74], %196 {strides = array<i32>} : memref<16x128xf32, #tpu.memory_space<vmem>>, vector<16x128xf32>,
    } else {
    }
    %c0 = arith.constant 0 : index
    %c0_1 = arith.constant 0 : index
    %c0_2 = arith.constant 0 : index
    %3 = vector.load %arg8[%c0, %c0_1, %c0_2] : memref<1x16x512xf32, #tpu.memory_space<vmem>>, vector<1x16x512xf32>
    %4 = vector.shape_cast %3 : vector<1x16x512xf32> to vector<16x512xf32>
    %5 = vector.extract_strided_slice %4 {offsets = [0, 0], sizes = [1, 128], strides = [1, 1]} : vector<16x512xf32> to vector<1x128xf32>
    %6 = vector.extract_strided_slice %4 {offsets = [1, 0], sizes = [1, 128], strides = [1, 1]} : vector<16x512xf32> to vector<1x128xf32>
    %7 = vector.extract_strided_slice %4 {offsets = [2, 0], sizes = [1, 384], strides = [1, 1]} : vector<16x512xf32> to vector<1x384xf32>
    %8 = vector.extract_strided_slice %4 {offsets = [3, 0], sizes = [1, 128], strides = [1, 1]} : vector<16x512xf32> to vector<1x128xf32>
    %9 = vector.extract_strided_slice %4 {offsets = [4, 0], sizes = [1, 128], strides = [1, 1]} : vector<16x512xf32> to vector<1x128xf32>
    %10 = vector.extract_strided_slice %4 {offsets = [5, 0], sizes = [1, 128], strides = [1, 1]} : vector<16x512xf32> to vector<1x128xf32>
    %11 = vector.extract_strided_slice %4 {offsets = [6, 0], sizes = [1, 512], strides = [1, 1]} : vector<16x512xf32> to vector<1x512xf32>
    %12 = vector.extract_strided_slice %4 {offsets = [7, 0], sizes = [1, 128], strides = [1, 1]} : vector<16x512xf32> to vector<1x128xf32>
    %13 = vector.extract_strided_slice %4 {offsets = [8, 0], sizes = [1, 128], strides = [1, 1]} : vector<16x512xf32> to vector<1x128xf32>
    %14 = vector.extract_strided_slice %4 {offsets = [9, 0], sizes = [1, 128], strides = [1, 1]} : vector<16x512xf32> to vector<1x128xf32>
    %c0_3 = arith.constant 0 : index
    %c0_4 = arith.constant 0 : index
    %15 = vector.load %arg9[%c0_3, %c0_4] : memref<16x128xf32, #tpu.memory_space<vmem>>, vector<16x128xf32>
    %cst = arith.constant dense<0.000000e+00> : vector<16xf32>
    %16 = vector.multi_reduction <add>, %15, %cst [1] : vector<16x128xf32> to vector<16xf32>
    %17 = vector.shape_cast %16 : vector<16xf32> to vector<16x1xf32>
    %cst_5 = arith.constant 1.280000e+02 : f32
    %18 = vector.broadcast %cst_5 : f32 to vector<16x1xf32>
    %19 = arith.divf %17, %18 : vector<16x1xf32>
    %20 = vector.broadcast %19 : vector<16x1xf32> to vector<16x128xf32>
    %21 = arith.subf %15, %20 : vector<16x128xf32>
    %22 = arith.mulf %21, %21 : vector<16x128xf32>
    %cst_6 = arith.constant dense<0.000000e+00> : vector<16xf32>
    %23 = vector.multi_reduction <add>, %22, %cst_6 [1] : vector<16x128xf32> to vector<16xf32>
    %24 = vector.shape_cast %23 : vector<16xf32> to vector<16x1xf32>
    %cst_7 = arith.constant 1.280000e+02 : f32
    %25 = vector.broadcast %cst_7 : f32 to vector<16x1xf32>
    %26 = arith.divf %24, %25 : vector<16x1xf32>
    %cst_8 = arith.constant 9.99999997E-7 : f32
    %27 = vector.broadcast %cst_8 : f32 to vector<16x1xf32>
    %28 = arith.addf %26, %27 : vector<16x1xf32>
    %29 = math.rsqrt %28 : vector<16x1xf32>
    %30 = vector.broadcast %29 : vector<16x1xf32> to vector<16x128xf32>
    %31 = arith.mulf %21, %30 : vector<16x128xf32>
    %32 = vector.broadcast %5 : vector<1x128xf32> to vector<16x128xf32>
    %33 = arith.mulf %31, %32 : vector<16x128xf32>
    %34 = vector.broadcast %6 : vector<1x128xf32> to vector<16x128xf32>
    %35 = arith.addf %33, %34 : vector<16x128xf32>
    %36 = arith.truncf %35 : vector<16x128xf32> to vector<16x128xbf16>
    %c0_9 = arith.constant 0 : index
    %c0_10 = arith.constant 0 : index
    %c0_11 = arith.constant 0 : index
    %37 = vector.load %arg4[%c0_9, %c0_10, %c0_11] : memref<1x128x384xbf16, #tpu.memory_space<vmem>>, vector<1x128x384xbf16>
    %38 = vector.shape_cast %37 : vector<1x128x384xbf16> to vector<128x384xbf16>
    %cst_12 = arith.constant dense<0.000000e+00> : vector<16x384xf32>
    %39 = tpu.matmul %36, %38, %cst_12 {dimension_numbers = #tpu.dot_dimension_numbers<[1], [0], [0], [1], [0, 0, 1, 1], [], []>} : vector<16x128xbf16>, vector<128x384xbf16>, vector<16x384xf32> -> vector<16x384xf32>
    %40 = vector.broadcast %7 : vector<1x384xf32> to vector<16x384xf32>
    %41 = arith.addf %39, %40 : vector<16x384xf32>
    %42 = vector.shape_cast %41 : vector<16x384xf32> to vector<2x8x384xf32>
    %43 = vector.extract_strided_slice %42 {offsets = [0, 0, 0], sizes = [2, 8, 128], strides = [1, 1, 1]} : vector<2x8x384xf32> to vector<2x8x128xf32>
    %cst_13 = arith.constant 0.176776692 : f32
    %44 = vector.broadcast %cst_13 : f32 to vector<2x8x128xf32>
    %45 = arith.mulf %43, %44 : vector<2x8x128xf32>
    %46 = vector.extract_strided_slice %42 {offsets = [0, 0, 128], sizes = [2, 8, 128], strides = [1, 1, 1]} : vector<2x8x384xf32> to vector<2x8x128xf32>
    %47 = vector.extract_strided_slice %42 {offsets = [0, 0, 256], sizes = [2, 8, 128], strides = [1, 1, 1]} : vector<2x8x384xf32> to vector<2x8x128xf32>
    %48 = vector.extract_strided_slice %45 {offsets = [0, 0, 0], sizes = [2, 8, 32], strides = [1, 1, 1]} : vector<2x8x128xf32> to vector<2x8x32xf32>
    %49 = arith.truncf %48 : vector<2x8x32xf32> to vector<2x8x32xbf16>
    %50 = vector.extract_strided_slice %46 {offsets = [0, 0, 0], sizes = [2, 8, 32], strides = [1, 1, 1]} : vector<2x8x128xf32> to vector<2x8x32xf32>
    %51 = arith.truncf %50 : vector<2x8x32xf32> to vector<2x8x32xbf16>
    %52 = vector.extract_strided_slice %47 {offsets = [0, 0, 0], sizes = [2, 8, 32], strides = [1, 1, 1]} : vector<2x8x128xf32> to vector<2x8x32xf32>
    %53 = arith.truncf %52 : vector<2x8x32xf32> to vector<2x8x32xbf16>
    "tpu.trace_start"() <{level = 10 : i32, message = "bqd,bkd->bqk"}> : () -> ()
    %cst_14 = arith.constant dense<0.000000e+00> : vector<2x8x8xf32>
    %54 = tpu.matmul %49, %51, %cst_14 {dimension_numbers = #tpu.dot_dimension_numbers<[2], [2], [1], [1], [0, 0, 0, 1, 1, 1], [0], [0]>} : vector<2x8x32xbf16>, vector<2x8x32xbf16>, vector<2x8x8xf32> -> vector<2x8x8xf32>
    "tpu.trace_stop"() : () -> ()
    %cst_15 = arith.constant dense<0xFF800000> : vector<2x8xf32>
    %55 = vector.multi_reduction <maximumf>, %54, %cst_15 [2] : vector<2x8x8xf32> to vector<2x8xf32>
    %56 = vector.shape_cast %55 : vector<2x8xf32> to vector<2x8x1xf32>
    %57 = vector.broadcast %56 : vector<2x8x1xf32> to vector<2x8x8xf32>
    %58 = arith.subf %54, %57 : vector<2x8x8xf32>
    %59 = math.exp %58 : vector<2x8x8xf32>
    %cst_16 = arith.constant dense<0.000000e+00> : vector<2x8xf32>
    %60 = vector.multi_reduction <add>, %59, %cst_16 [2] : vector<2x8x8xf32> to vector<2x8xf32>
    %61 = vector.shape_cast %60 : vector<2x8xf32> to vector<2x8x1xf32>
    %62 = tpu.reciprocal %61 {approx = true} : vector<2x8x1xf32> -> vector<2x8x1xf32>
    %63 = vector.broadcast %62 : vector<2x8x1xf32> to vector<2x8x8xf32>
    %64 = arith.mulf %59, %63 : vector<2x8x8xf32>
    %65 = arith.truncf %64 : vector<2x8x8xf32> to vector<2x8x8xbf16>
    "tpu.trace_start"() <{level = 10 : i32, message = "bqk,bkd->bqd"}> : () -> ()
    %cst_17 = arith.constant dense<0.000000e+00> : vector<2x8x32xf32>
    %66 = tpu.matmul %65, %53, %cst_17 {dimension_numbers = #tpu.dot_dimension_numbers<[2], [1], [1], [2], [0, 0, 0, 1, 1, 2], [0], [0]>} : vector<2x8x8xbf16>, vector<2x8x32xbf16>, vector<2x8x32xf32> -> vector<2x8x32xf32>
    "tpu.trace_stop"() : () -> ()
    %c0_18 = arith.constant 0 : index
    %c0_19 = arith.constant 0 : index
    %c0_20 = arith.constant 0 : index
    %67 = vector.load %arg10[%c0_18, %c0_19, %c0_20] : memref<2x8x128xf32, #tpu.memory_space<vmem>>, vector<2x8x32xf32>
    tpu.vector_store %arg10[%c0_18, %c0_19, %c0_20], %66 {strides = array<i32>} : memref<2x8x128xf32, #tpu.memory_space<vmem>>, vector<2x8x32xf32>,
    %68 = vector.extract_strided_slice %45 {offsets = [0, 0, 32], sizes = [2, 8, 32], strides = [1, 1, 1]} : vector<2x8x128xf32> to vector<2x8x32xf32>
    %69 = arith.truncf %68 : vector<2x8x32xf32> to vector<2x8x32xbf16>
    %70 = vector.extract_strided_slice %46 {offsets = [0, 0, 32], sizes = [2, 8, 32], strides = [1, 1, 1]} : vector<2x8x128xf32> to vector<2x8x32xf32>
    %71 = arith.truncf %70 : vector<2x8x32xf32> to vector<2x8x32xbf16>
    %72 = vector.extract_strided_slice %47 {offsets = [0, 0, 32], sizes = [2, 8, 32], strides = [1, 1, 1]} : vector<2x8x128xf32> to vector<2x8x32xf32>
    %73 = arith.truncf %72 : vector<2x8x32xf32> to vector<2x8x32xbf16>
    "tpu.trace_start"() <{level = 10 : i32, message = "bqd,bkd->bqk"}> : () -> ()
    %cst_21 = arith.constant dense<0.000000e+00> : vector<2x8x8xf32>
    %74 = tpu.matmul %69, %71, %cst_21 {dimension_numbers = #tpu.dot_dimension_numbers<[2], [2], [1], [1], [0, 0, 0, 1, 1, 1], [0], [0]>} : vector<2x8x32xbf16>, vector<2x8x32xbf16>, vector<2x8x8xf32> -> vector<2x8x8xf32>
    "tpu.trace_stop"() : () -> ()
    %cst_22 = arith.constant dense<0xFF800000> : vector<2x8xf32>
    %75 = vector.multi_reduction <maximumf>, %74, %cst_22 [2] : vector<2x8x8xf32> to vector<2x8xf32>
    %76 = vector.shape_cast %75 : vector<2x8xf32> to vector<2x8x1xf32>
    %77 = vector.broadcast %76 : vector<2x8x1xf32> to vector<2x8x8xf32>
    %78 = arith.subf %74, %77 : vector<2x8x8xf32>
    %79 = math.exp %78 : vector<2x8x8xf32>
    %cst_23 = arith.constant dense<0.000000e+00> : vector<2x8xf32>
    %80 = vector.multi_reduction <add>, %79, %cst_23 [2] : vector<2x8x8xf32> to vector<2x8xf32>
    %81 = vector.shape_cast %80 : vector<2x8xf32> to vector<2x8x1xf32>
    %82 = tpu.reciprocal %81 {approx = true} : vector<2x8x1xf32> -> vector<2x8x1xf32>
    %83 = vector.broadcast %82 : vector<2x8x1xf32> to vector<2x8x8xf32>
    %84 = arith.mulf %79, %83 : vector<2x8x8xf32>
    %85 = arith.truncf %84 : vector<2x8x8xf32> to vector<2x8x8xbf16>
    "tpu.trace_start"() <{level = 10 : i32, message = "bqk,bkd->bqd"}> : () -> ()
    %cst_24 = arith.constant dense<0.000000e+00> : vector<2x8x32xf32>
    %86 = tpu.matmul %85, %73, %cst_24 {dimension_numbers = #tpu.dot_dimension_numbers<[2], [1], [1], [2], [0, 0, 0, 1, 1, 2], [0], [0]>} : vector<2x8x8xbf16>, vector<2x8x32xbf16>, vector<2x8x32xf32> -> vector<2x8x32xf32>
    "tpu.trace_stop"() : () -> ()
    %c0_25 = arith.constant 0 : index
    %c0_26 = arith.constant 0 : index
    %c32 = arith.constant 32 : index
    %87 = vector.load %arg10[%c0_25, %c0_26, %c32] : memref<2x8x128xf32, #tpu.memory_space<vmem>>, vector<2x8x32xf32>
    tpu.vector_store %arg10[%c0_25, %c0_26, %c32], %86 {strides = array<i32>} : memref<2x8x128xf32, #tpu.memory_space<vmem>>, vector<2x8x32xf32>,
    %88 = vector.extract_strided_slice %45 {offsets = [0, 0, 64], sizes = [2, 8, 32], strides = [1, 1, 1]} : vector<2x8x128xf32> to vector<2x8x32xf32>
    %89 = arith.truncf %88 : vector<2x8x32xf32> to vector<2x8x32xbf16>
    %90 = vector.extract_strided_slice %46 {offsets = [0, 0, 64], sizes = [2, 8, 32], strides = [1, 1, 1]} : vector<2x8x128xf32> to vector<2x8x32xf32>
    %91 = arith.truncf %90 : vector<2x8x32xf32> to vector<2x8x32xbf16>
    %92 = vector.extract_strided_slice %47 {offsets = [0, 0, 64], sizes = [2, 8, 32], strides = [1, 1, 1]} : vector<2x8x128xf32> to vector<2x8x32xf32>
    %93 = arith.truncf %92 : vector<2x8x32xf32> to vector<2x8x32xbf16>
    "tpu.trace_start"() <{level = 10 : i32, message = "bqd,bkd->bqk"}> : () -> ()
    %cst_27 = arith.constant dense<0.000000e+00> : vector<2x8x8xf32>
    %94 = tpu.matmul %89, %91, %cst_27 {dimension_numbers = #tpu.dot_dimension_numbers<[2], [2], [1], [1], [0, 0, 0, 1, 1, 1], [0], [0]>} : vector<2x8x32xbf16>, vector<2x8x32xbf16>, vector<2x8x8xf32> -> vector<2x8x8xf32>
    "tpu.trace_stop"() : () -> ()
    %cst_28 = arith.constant dense<0xFF800000> : vector<2x8xf32>
    %95 = vector.multi_reduction <maximumf>, %94, %cst_28 [2] : vector<2x8x8xf32> to vector<2x8xf32>
    %96 = vector.shape_cast %95 : vector<2x8xf32> to vector<2x8x1xf32>
    %97 = vector.broadcast %96 : vector<2x8x1xf32> to vector<2x8x8xf32>
    %98 = arith.subf %94, %97 : vector<2x8x8xf32>
    %99 = math.exp %98 : vector<2x8x8xf32>
    %cst_29 = arith.constant dense<0.000000e+00> : vector<2x8xf32>
    %100 = vector.multi_reduction <add>, %99, %cst_29 [2] : vector<2x8x8xf32> to vector<2x8xf32>
    %101 = vector.shape_cast %100 : vector<2x8xf32> to vector<2x8x1xf32>
    %102 = tpu.reciprocal %101 {approx = true} : vector<2x8x1xf32> -> vector<2x8x1xf32>
    %103 = vector.broadcast %102 : vector<2x8x1xf32> to vector<2x8x8xf32>
    %104 = arith.mulf %99, %103 : vector<2x8x8xf32>
    %105 = arith.truncf %104 : vector<2x8x8xf32> to vector<2x8x8xbf16>
    "tpu.trace_start"() <{level = 10 : i32, message = "bqk,bkd->bqd"}> : () -> ()
    %cst_30 = arith.constant dense<0.000000e+00> : vector<2x8x32xf32>
    %106 = tpu.matmul %105, %93, %cst_30 {dimension_numbers = #tpu.dot_dimension_numbers<[2], [1], [1], [2], [0, 0, 0, 1, 1, 2], [0], [0]>} : vector<2x8x8xbf16>, vector<2x8x32xbf16>, vector<2x8x32xf32> -> vector<2x8x32xf32>
    "tpu.trace_stop"() : () -> ()
    %c0_31 = arith.constant 0 : index
    %c0_32 = arith.constant 0 : index
    %c64 = arith.constant 64 : index
    %107 = vector.load %arg10[%c0_31, %c0_32, %c64] : memref<2x8x128xf32, #tpu.memory_space<vmem>>, vector<2x8x32xf32>
    tpu.vector_store %arg10[%c0_31, %c0_32, %c64], %106 {strides = array<i32>} : memref<2x8x128xf32, #tpu.memory_space<vmem>>, vector<2x8x32xf32>,
    %108 = vector.extract_strided_slice %45 {offsets = [0, 0, 96], sizes = [2, 8, 32], strides = [1, 1, 1]} : vector<2x8x128xf32> to vector<2x8x32xf32>
    %109 = arith.truncf %108 : vector<2x8x32xf32> to vector<2x8x32xbf16>
    %110 = vector.extract_strided_slice %46 {offsets = [0, 0, 96], sizes = [2, 8, 32], strides = [1, 1, 1]} : vector<2x8x128xf32> to vector<2x8x32xf32>
    %111 = arith.truncf %110 : vector<2x8x32xf32> to vector<2x8x32xbf16>
    %112 = vector.extract_strided_slice %47 {offsets = [0, 0, 96], sizes = [2, 8, 32], strides = [1, 1, 1]} : vector<2x8x128xf32> to vector<2x8x32xf32>
    %113 = arith.truncf %112 : vector<2x8x32xf32> to vector<2x8x32xbf16>
    "tpu.trace_start"() <{level = 10 : i32, message = "bqd,bkd->bqk"}> : () -> ()
    %cst_33 = arith.constant dense<0.000000e+00> : vector<2x8x8xf32>
    %114 = tpu.matmul %109, %111, %cst_33 {dimension_numbers = #tpu.dot_dimension_numbers<[2], [2], [1], [1], [0, 0, 0, 1, 1, 1], [0], [0]>} : vector<2x8x32xbf16>, vector<2x8x32xbf16>, vector<2x8x8xf32> -> vector<2x8x8xf32>
    "tpu.trace_stop"() : () -> ()
    %cst_34 = arith.constant dense<0xFF800000> : vector<2x8xf32>
    %115 = vector.multi_reduction <maximumf>, %114, %cst_34 [2] : vector<2x8x8xf32> to vector<2x8xf32>
    %116 = vector.shape_cast %115 : vector<2x8xf32> to vector<2x8x1xf32>
    %117 = vector.broadcast %116 : vector<2x8x1xf32> to vector<2x8x8xf32>
    %118 = arith.subf %114, %117 : vector<2x8x8xf32>
    %119 = math.exp %118 : vector<2x8x8xf32>
    %cst_35 = arith.constant dense<0.000000e+00> : vector<2x8xf32>
    %120 = vector.multi_reduction <add>, %119, %cst_35 [2] : vector<2x8x8xf32> to vector<2x8xf32>
    %121 = vector.shape_cast %120 : vector<2x8xf32> to vector<2x8x1xf32>
    %122 = tpu.reciprocal %121 {approx = true} : vector<2x8x1xf32> -> vector<2x8x1xf32>
    %123 = vector.broadcast %122 : vector<2x8x1xf32> to vector<2x8x8xf32>
    %124 = arith.mulf %119, %123 : vector<2x8x8xf32>
    %125 = arith.truncf %124 : vector<2x8x8xf32> to vector<2x8x8xbf16>
    "tpu.trace_start"() <{level = 10 : i32, message = "bqk,bkd->bqd"}> : () -> ()
    %cst_36 = arith.constant dense<0.000000e+00> : vector<2x8x32xf32>
    %126 = tpu.matmul %125, %113, %cst_36 {dimension_numbers = #tpu.dot_dimension_numbers<[2], [1], [1], [2], [0, 0, 0, 1, 1, 2], [0], [0]>} : vector<2x8x8xbf16>, vector<2x8x32xbf16>, vector<2x8x32xf32> -> vector<2x8x32xf32>
    "tpu.trace_stop"() : () -> ()
    %c0_37 = arith.constant 0 : index
    %c0_38 = arith.constant 0 : index
    %c96 = arith.constant 96 : index
    %127 = vector.load %arg10[%c0_37, %c0_38, %c96] : memref<2x8x128xf32, #tpu.memory_space<vmem>>, vector<2x8x32xf32>
    tpu.vector_store %arg10[%c0_37, %c0_38, %c96], %126 {strides = array<i32>} : memref<2x8x128xf32, #tpu.memory_space<vmem>>, vector<2x8x32xf32>,
    %c0_39 = arith.constant 0 : index
    %c0_40 = arith.constant 0 : index
    %c0_41 = arith.constant 0 : index
    %128 = vector.load %arg10[%c0_39, %c0_40, %c0_41] : memref<2x8x128xf32, #tpu.memory_space<vmem>>, vector<2x8x128xf32>
    %129 = vector.shape_cast %128 : vector<2x8x128xf32> to vector<16x128xf32>
    %130 = arith.truncf %129 : vector<16x128xf32> to vector<16x128xbf16>
    %c0_42 = arith.constant 0 : index
    %c0_43 = arith.constant 0 : index
    %c0_44 = arith.constant 0 : index
    %131 = vector.load %arg5[%c0_42, %c0_43, %c0_44] : memref<1x128x128xbf16, #tpu.memory_space<vmem>>, vector<1x128x128xbf16>
    %132 = vector.shape_cast %131 : vector<1x128x128xbf16> to vector<128x128xbf16>
    %cst_45 = arith.constant dense<0.000000e+00> : vector<16x128xf32>
    %133 = tpu.matmul %130, %132, %cst_45 {dimension_numbers = #tpu.dot_dimension_numbers<[1], [0], [0], [1], [0, 0, 1, 1], [], []>} : vector<16x128xbf16>, vector<128x128xbf16>, vector<16x128xf32> -> vector<16x128xf32>
    %134 = vector.broadcast %8 : vector<1x128xf32> to vector<16x128xf32>
    %135 = arith.addf %133, %134 : vector<16x128xf32>
    %136 = arith.addf %15, %135 : vector<16x128xf32>
    %cst_46 = arith.constant dense<0.000000e+00> : vector<16xf32>
    %137 = vector.multi_reduction <add>, %136, %cst_46 [1] : vector<16x128xf32> to vector<16xf32>
    %138 = vector.shape_cast %137 : vector<16xf32> to vector<16x1xf32>
    %cst_47 = arith.constant 1.280000e+02 : f32
    %139 = vector.broadcast %cst_47 : f32 to vector<16x1xf32>
    %140 = arith.divf %138, %139 : vector<16x1xf32>
    %141 = vector.broadcast %140 : vector<16x1xf32> to vector<16x128xf32>
    %142 = arith.subf %136, %141 : vector<16x128xf32>
    %143 = arith.mulf %142, %142 : vector<16x128xf32>
    %cst_48 = arith.constant dense<0.000000e+00> : vector<16xf32>
    %144 = vector.multi_reduction <add>, %143, %cst_48 [1] : vector<16x128xf32> to vector<16xf32>
    %145 = vector.shape_cast %144 : vector<16xf32> to vector<16x1xf32>
    %cst_49 = arith.constant 1.280000e+02 : f32
    %146 = vector.broadcast %cst_49 : f32 to vector<16x1xf32>
    %147 = arith.divf %145, %146 : vector<16x1xf32>
    %cst_50 = arith.constant 9.99999997E-7 : f32
    %148 = vector.broadcast %cst_50 : f32 to vector<16x1xf32>
    %149 = arith.addf %147, %148 : vector<16x1xf32>
    %150 = math.rsqrt %149 : vector<16x1xf32>
    %151 = vector.broadcast %150 : vector<16x1xf32> to vector<16x128xf32>
    %152 = arith.mulf %142, %151 : vector<16x128xf32>
    %153 = vector.broadcast %9 : vector<1x128xf32> to vector<16x128xf32>
    %154 = arith.mulf %152, %153 : vector<16x128xf32>
    %155 = vector.broadcast %10 : vector<1x128xf32> to vector<16x128xf32>
    %156 = arith.addf %154, %155 : vector<16x128xf32>
    %157 = arith.truncf %156 : vector<16x128xf32> to vector<16x128xbf16>
    %c0_51 = arith.constant 0 : index
    %c0_52 = arith.constant 0 : index
    %c0_53 = arith.constant 0 : index
    %158 = vector.load %arg6[%c0_51, %c0_52, %c0_53] : memref<1x128x512xbf16, #tpu.memory_space<vmem>>, vector<1x128x512xbf16>
    %159 = vector.shape_cast %158 : vector<1x128x512xbf16> to vector<128x512xbf16>
    %cst_54 = arith.constant dense<0.000000e+00> : vector<16x512xf32>
    %160 = tpu.matmul %157, %159, %cst_54 {dimension_numbers = #tpu.dot_dimension_numbers<[1], [0], [0], [1], [0, 0, 1, 1], [], []>} : vector<16x128xbf16>, vector<128x512xbf16>, vector<16x512xf32> -> vector<16x512xf32>
    %161 = vector.broadcast %11 : vector<1x512xf32> to vector<16x512xf32>
    %162 = arith.addf %160, %161 : vector<16x512xf32>
    %cst_55 = arith.constant 5.000000e-01 : f32
    %163 = vector.broadcast %cst_55 : f32 to vector<16x512xf32>
    %164 = arith.mulf %163, %162 : vector<16x512xf32>
    %cst_56 = arith.constant 4.471500e-02 : f32
    %165 = vector.broadcast %cst_56 : f32 to vector<16x512xf32>
    %166 = arith.mulf %165, %162 : vector<16x512xf32>
    %167 = arith.mulf %166, %162 : vector<16x512xf32>
    %168 = arith.mulf %167, %162 : vector<16x512xf32>
    %169 = arith.addf %162, %168 : vector<16x512xf32>
    %cst_57 = arith.constant 0.797884583 : f32
    %170 = vector.broadcast %cst_57 : f32 to vector<16x512xf32>
    %171 = arith.mulf %170, %169 : vector<16x512xf32>
    %172 = math.tanh %171 : vector<16x512xf32>
    %cst_58 = arith.constant 1.000000e+00 : f32
    %173 = vector.broadcast %cst_58 : f32 to vector<16x512xf32>
    %174 = arith.addf %173, %172 : vector<16x512xf32>
    %175 = arith.mulf %164, %174 : vector<16x512xf32>
    %176 = arith.truncf %175 : vector<16x512xf32> to vector<16x512xbf16>
    %c0_59 = arith.constant 0 : index
    %c0_60 = arith.constant 0 : index
    %c0_61 = arith.constant 0 : index
    %177 = vector.load %arg7[%c0_59, %c0_60, %c0_61] : memref<1x512x128xbf16, #tpu.memory_space<vmem>>, vector<1x512x128xbf16>
    %178 = vector.shape_cast %177 : vector<1x512x128xbf16> to vector<512x128xbf16>
    %cst_62 = arith.constant dense<0.000000e+00> : vector<16x128xf32>
    %179 = tpu.matmul %176, %178, %cst_62 {dimension_numbers = #tpu.dot_dimension_numbers<[1], [0], [0], [1], [0, 0, 1, 1], [], []>} : vector<16x512xbf16>, vector<512x128xbf16>, vector<16x128xf32> -> vector<16x128xf32>
    %180 = vector.broadcast %12 : vector<1x128xf32> to vector<16x128xf32>
    %181 = arith.addf %179, %180 : vector<16x128xf32>
    %182 = arith.addf %136, %181 : vector<16x128xf32>
    %c0_63 = arith.constant 0 : index
    %c0_64 = arith.constant 0 : index
    %183 = vector.load %arg9[%c0_63, %c0_64] : memref<16x128xf32, #tpu.memory_space<vmem>>, vector<16x128xf32>
    tpu.vector_store %arg9[%c0_63, %c0_64], %182 {strides = array<i32>} : memref<16x128xf32, #tpu.memory_space<vmem>>, vector<16x128xf32>,
    %c1_i32 = arith.constant 1 : i32
    %184 = arith.cmpi eq, %arg0, %c1_i32 : i32
    %185 = arith.extui %184 : i1 to i32
    %c0_i32_65 = arith.constant 0 : i32
    %186 = arith.cmpi ne, %185, %c0_i32_65 : i32
    scf.if %186 {
      %cst_66 = arith.constant dense<0.000000e+00> : vector<16xf32>
      %187 = vector.multi_reduction <add>, %182, %cst_66 [1] : vector<16x128xf32> to vector<16xf32>
      %188 = vector.shape_cast %187 : vector<16xf32> to vector<16x1xf32>
      %cst_67 = arith.constant 1.280000e+02 : f32
      %189 = vector.broadcast %cst_67 : f32 to vector<16x1xf32>
      %190 = arith.divf %188, %189 : vector<16x1xf32>
      %191 = vector.broadcast %190 : vector<16x1xf32> to vector<16x128xf32>
      %192 = arith.subf %182, %191 : vector<16x128xf32>
      %193 = arith.mulf %192, %192 : vector<16x128xf32>
      %cst_68 = arith.constant dense<0.000000e+00> : vector<16xf32>
      %194 = vector.multi_reduction <add>, %193, %cst_68 [1] : vector<16x128xf32> to vector<16xf32>
      %195 = vector.shape_cast %194 : vector<16xf32> to vector<16x1xf32>
      %cst_69 = arith.constant 1.280000e+02 : f32
      %196 = vector.broadcast %cst_69 : f32 to vector<16x1xf32>
      %197 = arith.divf %195, %196 : vector<16x1xf32>
      %cst_70 = arith.constant 9.99999997E-7 : f32
      %198 = vector.broadcast %cst_70 : f32 to vector<16x1xf32>
      %199 = arith.addf %197, %198 : vector<16x1xf32>
      %200 = math.rsqrt %199 : vector<16x1xf32>
      %201 = vector.broadcast %200 : vector<16x1xf32> to vector<16x128xf32>
      %202 = arith.mulf %192, %201 : vector<16x128xf32>
      %203 = vector.broadcast %13 : vector<1x128xf32> to vector<16x128xf32>
      %204 = arith.mulf %202, %203 : vector<16x128xf32>
      %205 = vector.broadcast %14 : vector<1x128xf32> to vector<16x128xf32>
      %206 = arith.addf %204, %205 : vector<16x128xf32>
      %c0_71 = arith.constant 0 : index
      %c0_72 = arith.constant 0 : index
      %207 = vector.load %arg9[%c0_71, %c0_72] : memref<16x128xf32, #tpu.memory_space<vmem>>, vector<16x128xf32>
      tpu.vector_store %arg9[%c0_71, %c0_72], %206 {strides = array<i32>} : memref<16x128xf32, #tpu.memory_space<vmem>>, vector<16x128xf32>,
    } else {
    }
    return
  }
  func.func @transform_0(%arg0: i32) -> (i32, i32) {
    %c0_i32 = arith.constant 0 : i32
    %c0_i32_0 = arith.constant 0 : i32
    %c0_i32_1 = arith.constant 0 : i32
    return %c0_i32, %c0_i32_0 : i32, i32
  }
  func.func @transform_1(%arg0: i32) -> (i32, i32) {
    %c0_i32 = arith.constant 0 : i32
    %c0_i32_0 = arith.constant 0 : i32
    %c0_i32_1 = arith.constant 0 : i32
    return %c0_i32, %c0_i32_0 : i32, i32
  }
  func.func @transform_2(%arg0: i32) -> (i32, i32) {
    %c0_i32 = arith.constant 0 : i32
    %c0_i32_0 = arith.constant 0 : i32
    %c0_i32_1 = arith.constant 0 : i32
    return %c0_i32, %c0_i32_0 : i32, i32
  }
  func.func @transform_3(%arg0: i32) -> (i32, i32, i32) {
    %c0_i32 = arith.constant 0 : i32
    %c0_i32_0 = arith.constant 0 : i32
    %c0_i32_1 = arith.constant 0 : i32
    return %arg0, %c0_i32, %c0_i32_0 : i32, i32, i32
  }
  func.func @transform_4(%arg0: i32) -> (i32, i32, i32) {
    %c0_i32 = arith.constant 0 : i32
    %c0_i32_0 = arith.constant 0 : i32
    %c0_i32_1 = arith.constant 0 : i32
    return %arg0, %c0_i32, %c0_i32_0 : i32, i32, i32
  }
  func.func @transform_5(%arg0: i32) -> (i32, i32, i32) {
    %c0_i32 = arith.constant 0 : i32
    %c0_i32_0 = arith.constant 0 : i32
    %c0_i32_1 = arith.constant 0 : i32
    return %arg0, %c0_i32, %c0_i32_0 : i32, i32, i32
  }
  func.func @transform_6(%arg0: i32) -> (i32, i32, i32) {
    %c0_i32 = arith.constant 0 : i32
    %c0_i32_0 = arith.constant 0 : i32
    %c0_i32_1 = arith.constant 0 : i32
    return %arg0, %c0_i32, %c0_i32_0 : i32, i32, i32
  }
  func.func @transform_7(%arg0: i32) -> (i32, i32, i32) {
    %c0_i32 = arith.constant 0 : i32
    %c0_i32_0 = arith.constant 0 : i32
    %c0_i32_1 = arith.constant 0 : i32
    return %arg0, %c0_i32, %c0_i32_0 : i32, i32, i32
  }
  func.func @transform_8(%arg0: i32) -> (i32, i32) {
    %c0_i32 = arith.constant 0 : i32
    %c0_i32_0 = arith.constant 0 : i32
    %c0_i32_1 = arith.constant 0 : i32
    return %c0_i32, %c0_i32_0 : i32, i32
  }
}

</mosaic_0001>

<bundles_post_ra>
// kernel: cavmae_forward.2
= control target key start
LH: loop header
LB: loop body
LE: loop exit
PB: predicated region body
PF: predicated region fallthrough
CT: control target
= control target key end

     0   :  { %s1326_s2 = inlined_call_operand.vmem [shape: f32[128,128], index: 2, kind: input, shape index: {}]   ;;  %s1327_s3 = inlined_call_operand.vmem [shape: f32[128,128], index: 3, kind: input, shape index: {}]   ;;  %s1328_s0 = inlined_call_operand.vmem [shape: f32[128,128], index: 0, kind: input, shape index: {}]   ;;  %s1329_s1 = inlined_call_operand.vmem [shape: f32[1,128], index: 1, kind: input, shape index: {}]   ;;  %s1330_s4 = inlined_call_operand.vmem [shape: f32[128,128], index: 4, kind: input, shape index: {}]   ;;  %s1331_s5 = inlined_call_operand.vmem [shape: f32[128,128], index: 5, kind: output, shape index: {}]  }
   0x1   :  { %v74_v0 = vld [vmem:[%s1326_s2 + $0x78] sm:$0xff]  ;;  %v73_v2 = vld [vmem:[%s1326_s2 + $0x70] sm:$0xff]  ;;  %v72_v4 = vld [vmem:[%s1326_s2 + $0x68] sm:$0xff] }
   0x2   :  { %v235_v1 = vld [vmem:[%s1327_s3 + $0x78] sm:$0xff]  ;;  %803 = vmatprep.subr.mxu0 %v74_v0  ;;  %v234_v3 = vld [vmem:[%s1327_s3 + $0x70] sm:$0xff]  ;;  %v233_v5 = vld [vmem:[%s1327_s3 + $0x68] sm:$0xff] }
   0x3   :  { %859 = vmatprep.subr.mxu1 %v235_v1  ;;  %804 = vmatpush3.msra.mxu0 %v74_v0  ;;  %v71_v6 = vld [vmem:[%s1326_s2 + $0x60] sm:$0xff]  ;;  %v70_v8 = vld [vmem:[%s1326_s2 + $0x58] sm:$0xff]  ;;  %v69_v10 = vld [vmem:[%s1326_s2 + $0x50] sm:$0xff] }
   0x4   :  { %860 = vmatpush3.msra.mxu1 %v235_v1  ;;  %805 = vmatprep.subr.mxu0 %v73_v2  ;;  %v232_v7 = vld [vmem:[%s1327_s3 + $0x60] sm:$0xff]  ;;  %v231_v9 = vld [vmem:[%s1327_s3 + $0x58] sm:$0xff]  ;;  %v230_v11 = vld [vmem:[%s1327_s3 + $0x50] sm:$0xff] }
   0x5   :  { %861 = vmatprep.subr.mxu1 %v234_v3  ;;  %806 = vmatpush3.msra.mxu0 %v73_v2  ;;  %v68_v12 = vld [vmem:[%s1326_s2 + $0x48] sm:$0xff]  ;;  %v67_v14 = vld [vmem:[%s1326_s2 + $0x40] sm:$0xff]  ;;  %v66_v16 = vld [vmem:[%s1326_s2 + $0x38] sm:$0xff] }
   0x6   :  { %862 = vmatpush3.msra.mxu1 %v234_v3  ;;  %807 = vmatprep.subr.mxu0 %v72_v4  ;;  %v229_v13 = vld [vmem:[%s1327_s3 + $0x48] sm:$0xff]  ;;  %v228_v15 = vld [vmem:[%s1327_s3 + $0x40] sm:$0xff]  ;;  %v227_v17 = vld [vmem:[%s1327_s3 + $0x38] sm:$0xff] }
   0x7   :  { %863 = vmatprep.subr.mxu1 %v233_v5  ;;  %808 = vmatpush3.msra.mxu0 %v72_v4  ;;  %v65_v18 = vld [vmem:[%s1326_s2 + $0x30] sm:$0xff]  ;;  %v64_v20 = vld [vmem:[%s1326_s2 + $0x28] sm:$0xff]  ;;  %v63_v22 = vld [vmem:[%s1326_s2 + $0x20] sm:$0xff] }
   0x8   :  { %864 = vmatpush3.msra.mxu1 %v233_v5  ;;  %809 = vmatprep.subr.mxu0 %v71_v6  ;;  %v226_v19 = vld [vmem:[%s1327_s3 + $0x30] sm:$0xff]  ;;  %v225_v21 = vld [vmem:[%s1327_s3 + $0x28] sm:$0xff]  ;;  %v224_v23 = vld [vmem:[%s1327_s3 + $0x20] sm:$0xff] }
   0x9   :  { %865 = vmatprep.subr.mxu1 %v232_v7  ;;  %810 = vmatpush3.msra.mxu0 %v71_v6  ;;  %v62_v24 = vld [vmem:[%s1326_s2 + $0x18] sm:$0xff]  ;;  %v61_v26 = vld [vmem:[%s1326_s2 + $0x10] sm:$0xff]  ;;  %v20_v28 = vld [vmem:[%s1328_s0] sm:$0xff] }
   0xa   :  { %866 = vmatpush3.msra.mxu1 %v232_v7  ;;  %811 = vmatprep.subr.mxu0 %v70_v8  ;;  %v223_v25 = vld [vmem:[%s1327_s3 + $0x18] sm:$0xff]  ;;  %v222_v27 = vld [vmem:[%s1327_s3 + $0x10] sm:$0xff]  ;;  %v1155_v29 = vld [vmem:[%s1329_s1] ss:$0 sm:$0xff] }
   0xb   :  { %867 = vmatprep.subr.mxu1 %v231_v9  ;;  %812 = vmatpush3.msra.mxu0 %v70_v8  ;;  %v60_v30 = vld [vmem:[%s1326_s2 + $0x8] sm:$0xff]  ;;  %v59_v33 = vld [vmem:[%s1326_s2] sm:$0xff]  ;;  %v43_v35 = vmul.f32 %v1155_v29, %v20_v28  ;;  %v22_v36 = vld [vmem:[%s1328_s0 + $0x10] sm:$0xff] }
   0xc   :  { %868 = vmatpush3.msra.mxu1 %v231_v9  ;;  %813 = vmatprep.subr.mxu0 %v69_v10  ;;  %v221_v31 = vld [vmem:[%s1327_s3 + $0x8] sm:$0xff]  ;;  %v220_v34 = vld [vmem:[%s1327_s3] sm:$0xff]  ;;  %v45_v38 = vmul.f32 %v1155_v29, %v22_v36  ;;  %v23_v39 = vld [vmem:[%s1328_s0 + $0x18] sm:$0xff] }
   0xd   :  { %869 = vmatprep.subr.mxu1 %v230_v11  ;;  %814 = vmatpush3.msra.mxu0 %v69_v10  ;;  %v21_v32 = vld [vmem:[%s1328_s0 + $0x8] sm:$0xff]  ;;  %v24_v40 = vld [vmem:[%s1328_s0 + $0x20] sm:$0xff]  ;;  %v444_v41 = vld [vmem:[%s1330_s4 + $0x78] sm:$0xff]  ;;  %v46_v42 = vmul.f32 %v1155_v29, %v23_v39 }
   0xe   :  { %870 = vmatpush3.msra.mxu1 %v230_v11  ;;  %815 = vmatprep.subr.mxu0 %v68_v12  ;;  %v44_v37 = vmul.f32 %v1155_v29, %v21_v32  ;;  %v47_v43 = vmul.f32 %v1155_v29, %v24_v40  ;;  %v25_v44 = vld [vmem:[%s1328_s0 + $0x28] sm:$0xff]  ;;  %v26_v45 = vld [vmem:[%s1328_s0 + $0x30] sm:$0xff]  ;;  %v27_v49 = vld [vmem:[%s1328_s0 + $0x38] sm:$0xff] }
   0xf   :  { %871 = vmatprep.subr.mxu1 %v229_v13  ;;  %816 = vmatpush3.msra.mxu0 %v68_v12  ;;  %v443_v46 = vld [vmem:[%s1330_s4 + $0x70] sm:$0xff]  ;;  %v48_v47 = vmul.f32 %v1155_v29, %v25_v44  ;;  %v49_v48 = vmul.f32 %v1155_v29, %v26_v45  ;;  %v28_v50 = vld [vmem:[%s1328_s0 + $0x40] sm:$0xff]  ;;  %v442_v51 = vld [vmem:[%s1330_s4 + $0x68] sm:$0xff]  ;;  %v50_v52 = vmul.f32 %v1155_v29, %v27_v49 }
  0x10   :  { %872 = vmatpush3.msra.mxu1 %v229_v13  ;;  %817 = vmatprep.subr.mxu0 %v67_v14  ;;  %v51_v53 = vmul.f32 %v1155_v29, %v28_v50  ;;  %v29_v54 = vld [vmem:[%s1328_s0 + $0x48] sm:$0xff]  ;;  %v30_v55 = vld [vmem:[%s1328_s0 + $0x50] sm:$0xff]  ;;  %v441_v56 = vld [vmem:[%s1330_s4 + $0x60] sm:$0xff] }
  0x11   :  { %873 = vmatprep.subr.mxu1 %v228_v15  ;;  %818 = vmatpush3.msra.mxu0 %v67_v14  ;;  %v52_v57 = vmul.f32 %v1155_v29, %v29_v54  ;;  %v53_v58 = vmul.f32 %v1155_v29, %v30_v55  ;;  %v31_v59 = vld [vmem:[%s1328_s0 + $0x58] sm:$0xff]  ;;  %v32_v60 = vld [vmem:[%s1328_s0 + $0x60] sm:$0xff]  ;;  %v33_v0 = vld [vmem:[%s1328_s0 + $0x68] sm:$0xff] }
  0x12   :  { %874 = vmatpush3.msra.mxu1 %v228_v15  ;;  %819 = vmatprep.subr.mxu0 %v66_v16  ;;  %v440_v61 = vld [vmem:[%s1330_s4 + $0x58] sm:$0xff]  ;;  %v54_v62 = vmul.f32 %v1155_v29, %v31_v59  ;;  %v55_v63 = vmul.f32 %v1155_v29, %v32_v60  ;;  %v34_v1 = vld [vmem:[%s1328_s0 + $0x70] sm:$0xff]  ;;  %v56_v3 = vmul.f32 %v1155_v29, %v33_v0  ;;  %v438_v6 = vld [vmem:[%s1330_s4 + $0x48] sm:$0xff] }
  0x13   :  { %875 = vmatprep.subr.mxu1 %v227_v17  ;;  %820 = vmatpush3.msra.mxu0 %v66_v16  ;;  %v439_v2 = vld [vmem:[%s1330_s4 + $0x50] sm:$0xff]  ;;  %v57_v4 = vmul.f32 %v1155_v29, %v34_v1  ;;  %v35_v5 = vld [vmem:[%s1328_s0 + $0x78] sm:$0xff]  ;;  %v437_v8 = vld [vmem:[%s1330_s4 + $0x40] sm:$0xff] }
  0x14   :  { %876 = vmatpush3.msra.mxu1 %v227_v17  ;;  %821 = vmatprep.subr.mxu0 %v65_v18  ;;  %v58_v7 = vmul.f32 %v1155_v29, %v35_v5  ;;  %v436_v9 = vld [vmem:[%s1330_s4 + $0x38] sm:$0xff]  ;;  %v435_v10 = vld [vmem:[%s1330_s4 + $0x30] sm:$0xff]  ;;  %v434_v11 = vld [vmem:[%s1330_s4 + $0x28] sm:$0xff] }
  0x15   :  { %877 = vmatprep.subr.mxu1 %v226_v19  ;;  %822 = vmatpush3.msra.mxu0 %v65_v18  ;;  %v433_v12 = vld [vmem:[%s1330_s4 + $0x20] sm:$0xff]  ;;  %v432_v13 = vld [vmem:[%s1330_s4 + $0x18] sm:$0xff]  ;;  %v431_v14 = vld [vmem:[%s1330_s4 + $0x10] sm:$0xff] }
  0x16   :  { %878 = vmatpush3.msra.mxu1 %v226_v19  ;;  %823 = vmatprep.subr.mxu0 %v64_v20  ;;  %v430_v15 = vld [vmem:[%s1330_s4 + $0x8] sm:$0xff]  ;;  %v429_v16 = vld [vmem:[%s1330_s4] sm:$0xff] }
  0x17   :  { %879 = vmatprep.subr.mxu1 %v225_v21  ;;  %824 = vmatpush3.msra.mxu0 %v64_v20 }
  0x18   :  { %880 = vmatpush3.msra.mxu1 %v225_v21  ;;  %825 = vmatprep.subr.mxu0 %v63_v22 }
  0x19   :  { %881 = vmatprep.subr.mxu1 %v224_v23  ;;  %826 = vmatpush3.msra.mxu0 %v63_v22 }
  0x1a   :  { %882 = vmatpush3.msra.mxu1 %v224_v23  ;;  %827 = vmatprep.subr.mxu0 %v62_v24 }
  0x1b   :  { %883 = vmatprep.subr.mxu1 %v223_v25  ;;  %828 = vmatpush3.msra.mxu0 %v62_v24 }
  0x1c   :  { %884 = vmatpush3.msra.mxu1 %v223_v25  ;;  %829 = vmatprep.subr.mxu0 %v61_v26 }
  0x1d   :  { %885 = vmatprep.subr.mxu1 %v222_v27  ;;  %830 = vmatpush3.msra.mxu0 %v61_v26 }
  0x1e   :  { %886 = vmatpush3.msra.mxu1 %v222_v27  ;;  %831 = vmatprep.subr.mxu0 %v60_v30 }
  0x1f   :  { %887 = vmatprep.subr.mxu1 %v221_v31  ;;  %832 = vmatpush3.msra.mxu0 %v60_v30 }
  0x20   :  { %888 = vmatpush3.msra.mxu1 %v221_v31  ;;  %833 = vmatprep.subr.mxu0 %v59_v33 }
  0x21   :  { %889 = vmatprep.subr.mxu1 %v220_v34  ;;  %834 = vmatpush3.msra.mxu0 %v59_v33 }
  0x22   :  { %835 = vmatprep.mubr.f32.mxu0 %v43_v35  ;;  %890 = vmatpush3.msra.mxu1 %v220_v34 }
  0x23   :  { %891 = vmatprep.mubr.f32.mxu1 %v43_v35  ;;  %836 = vmatmul.mubr.f32.vlgmr.msra.gmra.mxu0 %v44_v37 }
  0x24   :  { %892 = vmatmul.mubr.f32.vlgmr.msra.gmra.mxu1 %v44_v37  ;;  %838 = vmatprep.mubr.f32.mxu0 %v45_v38 }
  0x25   :  { %894 = vmatprep.mubr.f32.mxu1 %v45_v38  ;;  %915 = vmatprep.subr.mxu0 %v444_v41 }
  0x26   :  { %971 = vmatprep.subr.mxu1 %v444_v41  ;;  %916 = vmatpush3.msra.mxu0 %v444_v41 }
  0x27   :  { %987 = vmatpush3.msra.mxu1 %v444_v41  ;;  %839 = vmatmul.mubr.f32.gmra.mxu0 %v46_v42 }
  0x28   :  { %895 = vmatmul.mubr.f32.gmra.mxu1 %v46_v42  ;;  %841 = vmatprep.mubr.f32.mxu0 %v47_v43 }
  0x29   :  { %897 = vmatprep.mubr.f32.mxu1 %v47_v43  ;;  %917 = vmatprep.subr.mxu0 %v443_v46 }
  0x2a   :  { %972 = vmatprep.subr.mxu1 %v443_v46  ;;  %918 = vmatpush3.msra.mxu0 %v443_v46 }
  0x2b   :  { %988 = vmatpush3.msra.mxu1 %v443_v46  ;;  %842 = vmatmul.mubr.f32.gmra.mxu0 %v48_v47 }
  0x2c   :  { %898 = vmatmul.mubr.f32.gmra.mxu1 %v48_v47  ;;  %844 = vmatprep.mubr.f32.mxu0 %v49_v48 }
  0x2d   :  { %900 = vmatprep.mubr.f32.mxu1 %v49_v48  ;;  %919 = vmatprep.subr.mxu0 %v442_v51 }
  0x2e   :  { %973 = vmatprep.subr.mxu1 %v442_v51  ;;  %920 = vmatpush3.msra.mxu0 %v442_v51 }
  0x2f   :  { %989 = vmatpush3.msra.mxu1 %v442_v51  ;;  %845 = vmatmul.mubr.f32.gmra.mxu0 %v50_v52 }
  0x30   :  { %901 = vmatmul.mubr.f32.gmra.mxu1 %v50_v52  ;;  %847 = vmatprep.mubr.f32.mxu0 %v51_v53 }
  0x31   :  { %903 = vmatprep.mubr.f32.mxu1 %v51_v53  ;;  %921 = vmatprep.subr.mxu0 %v441_v56 }
  0x32   :  { %974 = vmatprep.subr.mxu1 %v441_v56  ;;  %922 = vmatpush3.msra.mxu0 %v441_v56 }
  0x33   :  { %990 = vmatpush3.msra.mxu1 %v441_v56  ;;  %848 = vmatmul.mubr.f32.gmra.mxu0 %v52_v57 }
  0x34   :  { %904 = vmatmul.mubr.f32.gmra.mxu1 %v52_v57  ;;  %850 = vmatprep.mubr.f32.mxu0 %v53_v58 }
  0x35   :  { %906 = vmatprep.mubr.f32.mxu1 %v53_v58  ;;  %923 = vmatprep.subr.mxu0 %v440_v61 }
  0x36   :  { %975 = vmatprep.subr.mxu1 %v440_v61  ;;  %924 = vmatpush3.msra.mxu0 %v440_v61 }
  0x37   :  { %991 = vmatpush3.msra.mxu1 %v440_v61  ;;  %851 = vmatmul.mubr.f32.gmra.mxu0 %v54_v62 }
  0x38   :  { %907 = vmatmul.mubr.f32.gmra.mxu1 %v54_v62  ;;  %853 = vmatprep.mubr.f32.mxu0 %v55_v63 }
  0x39   :  { %909 = vmatprep.mubr.f32.mxu1 %v55_v63  ;;  %925 = vmatprep.subr.mxu0 %v439_v2 }
  0x3a   :  { %976 = vmatprep.subr.mxu1 %v439_v2  ;;  %926 = vmatpush3.msra.mxu0 %v439_v2 }
  0x3b   :  { %992 = vmatpush3.msra.mxu1 %v439_v2  ;;  %854 = vmatmul.mubr.f32.gmra.mxu0 %v56_v3 }
  0x3c   :  { %910 = vmatmul.mubr.f32.gmra.mxu1 %v56_v3  ;;  %856 = vmatprep.mubr.f32.mxu0 %v57_v4 }
  0x3d   :  { %912 = vmatprep.mubr.f32.mxu1 %v57_v4  ;;  %927 = vmatprep.subr.mxu0 %v438_v6 }
  0x3e   :  { %977 = vmatprep.subr.mxu1 %v438_v6  ;;  %928 = vmatpush3.msra.mxu0 %v438_v6 }
  0x3f   :  { %993 = vmatpush3.msra.mxu1 %v438_v6  ;;  %857 = vmatmul.mubr.f32.gmra.mxu0 %v58_v7 }
  0x40   :  { %913 = vmatmul.mubr.f32.gmra.mxu1 %v58_v7  ;;  %929 = vmatprep.subr.mxu0 %v437_v8 }
  0x41   :  { %978 = vmatprep.subr.mxu1 %v437_v8  ;;  %930 = vmatpush3.msra.mxu0 %v437_v8 }
  0x42   :  { %994 = vmatpush3.msra.mxu1 %v437_v8  ;;  %931 = vmatprep.subr.mxu0 %v436_v9 }
  0x43   :  { %979 = vmatprep.subr.mxu1 %v436_v9  ;;  %932 = vmatpush3.msra.mxu0 %v436_v9 }
  0x44   :  { %995 = vmatpush3.msra.mxu1 %v436_v9  ;;  %933 = vmatprep.subr.mxu0 %v435_v10 }
  0x45   :  { %980 = vmatprep.subr.mxu1 %v435_v10  ;;  %934 = vmatpush3.msra.mxu0 %v435_v10 }
  0x46   :  { %996 = vmatpush3.msra.mxu1 %v435_v10  ;;  %935 = vmatprep.subr.mxu0 %v434_v11 }
  0x47   :  { %981 = vmatprep.subr.mxu1 %v434_v11  ;;  %936 = vmatpush3.msra.mxu0 %v434_v11 }
  0x48   :  { %997 = vmatpush3.msra.mxu1 %v434_v11  ;;  %937 = vmatprep.subr.mxu0 %v433_v12 }
  0x49   :  { %982 = vmatprep.subr.mxu1 %v433_v12  ;;  %938 = vmatpush3.msra.mxu0 %v433_v12 }
  0x4a   :  { %998 = vmatpush3.msra.mxu1 %v433_v12  ;;  %939 = vmatprep.subr.mxu0 %v432_v13 }
  0x4b   :  { %983 = vmatprep.subr.mxu1 %v432_v13  ;;  %940 = vmatpush3.msra.mxu0 %v432_v13 }
  0x4c   :  { %999 = vmatpush3.msra.mxu1 %v432_v13  ;;  %941 = vmatprep.subr.mxu0 %v431_v14 }
  0x4d   :  { %984 = vmatprep.subr.mxu1 %v431_v14  ;;  %942 = vmatpush3.msra.mxu0 %v431_v14 }
  0x4e   :  { %1000 = vmatpush3.msra.mxu1 %v431_v14  ;;  %943 = vmatprep.subr.mxu0 %v430_v15 }
  0x4f   :  { %985 = vmatprep.subr.mxu1 %v430_v15  ;;  %944 = vmatpush3.msra.mxu0 %v430_v15 }
  0x50   :  { %1001 = vmatpush3.msra.mxu1 %v430_v15  ;;  %945 = vmatprep.subr.mxu0 %v429_v16 }
  0x51   :  { %986 = vmatprep.subr.mxu1 %v429_v16  ;;  %946 = vmatpush3.msra.mxu0 %v429_v16 }
  0x52   :  { %1002 = vmatpush3.msra.mxu1 %v429_v16 }
  0xe3   :  { %v837_v17 = vpop.f32.mrf.mxu0 }
  0xe4   :  { %v893_v18 = vpop.f32.mrf.mxu1  ;;  %v382_v19 = vmul.f32 %v837_v17, %v837_v17 }
  0xe5   :  { %v398_v20 = vmul.f32 %v893_v18, %v893_v18  ;;  %v141_v21 = vpop.f32.mrf.mxu0 }
  0xe6   :  { %v302_v22 = vpop.f32.mrf.mxu1  ;;  %v381_v23 = vmul.f32 %v141_v21, %v141_v21 }
  0xe7   :  { %v397_v24 = vmul.f32 %v302_v22, %v302_v22  ;;  %v840_v25 = vpop.f32.mrf.mxu0  ;;  %v414_v28 = vadd.f32 %v398_v20, %v382_v19 }
  0xe8   :  { %v896_v26 = vpop.f32.mrf.mxu1  ;;  %v384_v29 = vmul.f32 %v840_v25, %v840_v25 }
  0xe9   :  { %v413_v27 = vadd.f32 %v397_v24, %v381_v23  ;;  %v400_v30 = vmul.f32 %v896_v26, %v896_v26  ;;  %v151_v31 = vpop.f32.mrf.mxu0 }
  0xea   :  { %v312_v32 = vpop.f32.mrf.mxu1  ;;  %v383_v33 = vmul.f32 %v151_v31, %v151_v31 }
  0xeb   :  { %v399_v34 = vmul.f32 %v312_v32, %v312_v32  ;;  %947 = vmatprep.mubr.f32.mxu0 %v413_v27  ;;  %v843_v35 = vpop.f32.mrf.mxu0  ;;  %v416_v38 = vadd.f32 %v400_v30, %v384_v29 }
  0xec   :  { %v899_v36 = vpop.f32.mrf.mxu1  ;;  %948 = vmatmul.mubr.f32.vlgmr.msra.gmra.mxu0 %v414_v28  ;;  %v386_v39 = vmul.f32 %v843_v35, %v843_v35 }
  0xed   :  { %v415_v37 = vadd.f32 %v399_v34, %v383_v33  ;;  %v402_v40 = vmul.f32 %v899_v36, %v899_v36  ;;  %v161_v41 = vpop.f32.mrf.mxu0 }
  0xee   :  { %v322_v42 = vpop.f32.mrf.mxu1  ;;  %v385_v43 = vmul.f32 %v161_v41, %v161_v41 }
  0xef   :  { %v401_v44 = vmul.f32 %v322_v42, %v322_v42  ;;  %950 = vmatprep.mubr.f32.mxu0 %v415_v37  ;;  %v846_v45 = vpop.f32.mrf.mxu0  ;;  %v418_v48 = vadd.f32 %v402_v40, %v386_v39 }
  0xf0   :  { %v902_v46 = vpop.f32.mrf.mxu1  ;;  %951 = vmatmul.mubr.f32.gmra.mxu0 %v416_v38  ;;  %v388_v49 = vmul.f32 %v846_v45, %v846_v45 }
  0xf1   :  { %v417_v47 = vadd.f32 %v401_v44, %v385_v43  ;;  %v404_v50 = vmul.f32 %v902_v46, %v902_v46  ;;  %v171_v51 = vpop.f32.mrf.mxu0 }
  0xf2   :  { %v332_v52 = vpop.f32.mrf.mxu1  ;;  %v387_v53 = vmul.f32 %v171_v51, %v171_v51 }
  0xf3   :  { %v403_v54 = vmul.f32 %v332_v52, %v332_v52  ;;  %953 = vmatprep.mubr.f32.mxu0 %v417_v47  ;;  %v849_v55 = vpop.f32.mrf.mxu0  ;;  %v420_v58 = vadd.f32 %v404_v50, %v388_v49 }
  0xf4   :  { %v905_v56 = vpop.f32.mrf.mxu1  ;;  %954 = vmatmul.mubr.f32.gmra.mxu0 %v418_v48  ;;  %v390_v59 = vmul.f32 %v849_v55, %v849_v55 }
  0xf5   :  { %v419_v57 = vadd.f32 %v403_v54, %v387_v53  ;;  %v406_v60 = vmul.f32 %v905_v56, %v905_v56  ;;  %v181_v61 = vpop.f32.mrf.mxu0 }
  0xf6   :  { %v342_v62 = vpop.f32.mrf.mxu1  ;;  %v389_v63 = vmul.f32 %v181_v61, %v181_v61 }
  0xf7   :  { %v405_v0 = vmul.f32 %v342_v62, %v342_v62  ;;  %956 = vmatprep.mubr.f32.mxu0 %v419_v57  ;;  %v852_v1 = vpop.f32.mrf.mxu0  ;;  %v422_v4 = vadd.f32 %v406_v60, %v390_v59 }
  0xf8   :  { %v908_v2 = vpop.f32.mrf.mxu1  ;;  %957 = vmatmul.mubr.f32.gmra.mxu0 %v420_v58  ;;  %v392_v5 = vmul.f32 %v852_v1, %v852_v1 }
  0xf9   :  { %v421_v3 = vadd.f32 %v405_v0, %v389_v63  ;;  %v408_v6 = vmul.f32 %v908_v2, %v908_v2  ;;  %v191_v7 = vpop.f32.mrf.mxu0 }
  0xfa   :  { %v352_v8 = vpop.f32.mrf.mxu1  ;;  %v391_v9 = vmul.f32 %v191_v7, %v191_v7 }
  0xfb   :  { %v407_v10 = vmul.f32 %v352_v8, %v352_v8  ;;  %959 = vmatprep.mubr.f32.mxu1 %v421_v3  ;;  %v855_v11 = vpop.f32.mrf.mxu0  ;;  %v424_v14 = vadd.f32 %v408_v6, %v392_v5 }
  0xfc   :  { %v911_v12 = vpop.f32.mrf.mxu1  ;;  %960 = vmatmul.mubr.f32.vlgmr.msra.gmra.mxu1 %v422_v4  ;;  %v394_v15 = vmul.f32 %v855_v11, %v855_v11 }
  0xfd   :  { %v423_v13 = vadd.f32 %v407_v10, %v391_v9  ;;  %v410_v16 = vmul.f32 %v911_v12, %v911_v12  ;;  %v201_v17 = vpop.f32.mrf.mxu0 }
  0xfe   :  { %v362_v18 = vpop.f32.mrf.mxu1  ;;  %v393_v19 = vmul.f32 %v201_v17, %v201_v17 }
  0xff   :  { %v409_v20 = vmul.f32 %v362_v18, %v362_v18  ;;  %962 = vmatprep.mubr.f32.mxu1 %v423_v13  ;;  %v858_v21 = vpop.f32.mrf.mxu0  ;;  %v426_v24 = vadd.f32 %v410_v16, %v394_v15 }
 0x100   :  { %v914_v22 = vpop.f32.mrf.mxu1  ;;  %963 = vmatmul.mubr.f32.gmra.mxu1 %v424_v14  ;;  %v396_v25 = vmul.f32 %v858_v21, %v858_v21 }
 0x101   :  { %v425_v23 = vadd.f32 %v409_v20, %v393_v19  ;;  %v412_v26 = vmul.f32 %v914_v22, %v914_v22  ;;  %v211_v27 = vpop.f32.mrf.mxu0 }
 0x102   :  { %v372_v28 = vpop.f32.mrf.mxu1  ;;  %v395_v29 = vmul.f32 %v211_v27, %v211_v27 }
 0x103   :  { %v411_v30 = vmul.f32 %v372_v28, %v372_v28  ;;  %965 = vmatprep.mubr.f32.mxu1 %v425_v23  ;;  %v428_v32 = vadd.f32 %v412_v26, %v396_v25 }
 0x104   :  { %966 = vmatmul.mubr.f32.gmra.mxu1 %v426_v24 }
 0x105   :  { %v427_v31 = vadd.f32 %v411_v30, %v395_v29 }
 0x107   :  { %968 = vmatprep.mubr.f32.mxu1 %v427_v31 }
 0x108   :  { %969 = vmatmul.mubr.f32.gmra.mxu1 %v428_v32 }
 0x1ac   :  { %v949_v33 = vpop.f32.mrf.mxu0 }
 0x1ad   :  { %v591_v34 = vmax.f32 %v949_v33, 1e-10 }
 0x1ae   :  { %v511_v35 = vpop.f32.mrf.mxu0 }
 0x1af   :  { %1003 = vlog2.f32 %v591_v34  ;;  %v590_v36 = vmax.f32 %v511_v35, 1e-10 }
 0x1b0   :  { %v952_v37 = vpop.f32.mrf.mxu0 }
 0x1b1   :  { %1005 = vlog2.f32 %v590_v36  ;;  %v593_v38 = vmax.f32 %v952_v37, 1e-10 }
 0x1b2   :  { %v521_v39 = vpop.f32.mrf.mxu0 }
 0x1b3   :  { %1007 = vlog2.f32 %v593_v38  ;;  %v592_v40 = vmax.f32 %v521_v39, 1e-10 }
 0x1b4   :  { %v955_v41 = vpop.f32.mrf.mxu0 }
 0x1b5   :  { %1009 = vlog2.f32 %v592_v40  ;;  %v595_v42 = vmax.f32 %v955_v41, 1e-10 }
 0x1b6   :  { %v531_v43 = vpop.f32.mrf.mxu0 }
 0x1b7   :  { %1011 = vlog2.f32 %v595_v42  ;;  %v594_v44 = vmax.f32 %v531_v43, 1e-10 }
 0x1b8   :  { %v958_v45 = vpop.f32.mrf.mxu0 }
 0x1b9   :  { %1013 = vlog2.f32 %v594_v44  ;;  %v597_v46 = vmax.f32 %v958_v45, 1e-10 }
 0x1ba   :  { %v541_v47 = vpop.f32.mrf.mxu0 }
 0x1bb   :  { %1015 = vlog2.f32 %v597_v46  ;;  %v596_v48 = vmax.f32 %v541_v47, 1e-10 }
 0x1bc   :  { %v1004_v49 = vpop.eup %1003  ;;  %v961_v50 = vpop.f32.mrf.mxu1 }
 0x1bd   :  { %v609_v51 = vmul.f32 0.6931472, %v1004_v49  ;;  %1017 = vlog2.f32 %v596_v48  ;;  %v599_v52 = vmax.f32 %v961_v50, 1e-10 }
 0x1be   :  { %v1006_v53 = vpop.eup %1005  ;;  %v551_v54 = vpop.f32.mrf.mxu1 }
 0x1bf   :  { %v692_v55 = vadd.f32 5.081, %v609_v51  ;;  %v607_v56 = vmul.f32 0.6931472, %v1006_v53  ;;  %1019 = vlog2.f32 %v599_v52  ;;  %v598_v57 = vmax.f32 %v551_v54, 1e-10 }
 0x1c0   :  { %v1008_v58 = vpop.eup %1007  ;;  %v964_v59 = vpop.f32.mrf.mxu1 }
 0x1c1   :  { %v655_v60 = vmul.f32 0.22297041, %v692_v55  ;;  %v691_v61 = vadd.f32 5.081, %v607_v56  ;;  %v613_v62 = vmul.f32 0.6931472, %v1008_v58  ;;  %1021 = vlog2.f32 %v598_v57 }
 0x1c2   :  { %v1010_v63 = vpop.eup %1009  ;;  %v601_v0 = vmax.f32 %v964_v59, 1e-10  ;;  %v561_v1 = vpop.f32.mrf.mxu1 }
 0x1c3   :  { %671 = vst [vmem:[%s1331_s5 + $0x8] sm:$0xff] %v655_v60  ;;  %v654_v2 = vmul.f32 0.22297041, %v691_v61  ;;  %v694_v3 = vadd.f32 5.081, %v613_v62 }
 0x1c4   :  { %v611_v4 = vmul.f32 0.6931472, %v1010_v63  ;;  %v1012_v5 = vpop.eup %1011  ;;  %1023 = vlog2.f32 %v601_v0  ;;  %v600_v6 = vmax.f32 %v561_v1, 1e-10  ;;  %v967_v7 = vpop.f32.mrf.mxu1 }
 0x1c5   :  { %670 = vst [vmem:[%s1331_s5] sm:$0xff] %v654_v2  ;;  %v657_v8 = vmul.f32 0.22297041, %v694_v3  ;;  %v617_v10 = vmul.f32 0.6931472, %v1012_v5  ;;  %v603_v12 = vmax.f32 %v967_v7, 1e-10 }
 0x1c6   :  { %v693_v9 = vadd.f32 5.081, %v611_v4  ;;  %v1014_v11 = vpop.eup %1013  ;;  %1025 = vlog2.f32 %v600_v6  ;;  %v571_v13 = vpop.f32.mrf.mxu1 }
 0x1c7   :  { %673 = vst [vmem:[%s1331_s5 + $0x18] sm:$0xff] %v657_v8  ;;  %v696_v15 = vadd.f32 5.081, %v617_v10  ;;  %v615_v16 = vmul.f32 0.6931472, %v1014_v11  ;;  %1027 = vlog2.f32 %v603_v12 }
 0x1c8   :  { %v656_v14 = vmul.f32 0.22297041, %v693_v9  ;;  %v1016_v17 = vpop.eup %1015  ;;  %v602_v18 = vmax.f32 %v571_v13, 1e-10  ;;  %v970_v19 = vpop.f32.mrf.mxu1 }
 0x1c9   :  { %v659_v20 = vmul.f32 0.22297041, %v696_v15  ;;  %v695_v21 = vadd.f32 5.081, %v615_v16  ;;  %v621_v22 = vmul.f32 0.6931472, %v1016_v17 }
 0x1ca   :  { %672 = vst [vmem:[%s1331_s5 + $0x10] sm:$0xff] %v656_v14  ;;  %v1018_v23 = vpop.eup %1017  ;;  %1029 = vlog2.f32 %v602_v18  ;;  %v605_v24 = vmax.f32 %v970_v19, 1e-10  ;;  %v581_v25 = vpop.f32.mrf.mxu1 }
 0x1cb   :  { %675 = vst [vmem:[%s1331_s5 + $0x28] sm:$0xff] %v659_v20  ;;  %v658_v26 = vmul.f32 0.22297041, %v695_v21  ;;  %v698_v27 = vadd.f32 5.081, %v621_v22 }
 0x1cc   :  { %v619_v28 = vmul.f32 0.6931472, %v1018_v23  ;;  %v1020_v29 = vpop.eup %1019  ;;  %1031 = vlog2.f32 %v605_v24  ;;  %v604_v30 = vmax.f32 %v581_v25, 1e-10 }
 0x1cd   :  { %674 = vst [vmem:[%s1331_s5 + $0x20] sm:$0xff] %v658_v26  ;;  %v661_v31 = vmul.f32 0.22297041, %v698_v27  ;;  %v625_v33 = vmul.f32 0.6931472, %v1020_v29 }
 0x1ce   :  { %v697_v32 = vadd.f32 5.081, %v619_v28  ;;  %v1022_v34 = vpop.eup %1021  ;;  %1033 = vlog2.f32 %v604_v30 }
 0x1cf   :  { %677 = vst [vmem:[%s1331_s5 + $0x38] sm:$0xff] %v661_v31  ;;  %v700_v36 = vadd.f32 5.081, %v625_v33  ;;  %v623_v37 = vmul.f32 0.6931472, %v1022_v34 }
 0x1d0   :  { %v660_v35 = vmul.f32 0.22297041, %v697_v32 }
 0x1d1   :  { %v1024_v38 = vpop.eup %1023  ;;  %v663_v39 = vmul.f32 0.22297041, %v700_v36  ;;  %v699_v40 = vadd.f32 5.081, %v623_v37 }
 0x1d2   :  { %676 = vst [vmem:[%s1331_s5 + $0x30] sm:$0xff] %v660_v35  ;;  %v629_v41 = vmul.f32 0.6931472, %v1024_v38 }
 0x1d3   :  { %v1026_v42 = vpop.eup %1025  ;;  %679 = vst [vmem:[%s1331_s5 + $0x48] sm:$0xff] %v663_v39  ;;  %v662_v43 = vmul.f32 0.22297041, %v699_v40 }
 0x1d4   :  { %v702_v44 = vadd.f32 5.081, %v629_v41  ;;  %v627_v45 = vmul.f32 0.6931472, %v1026_v42  ;;  %v1028_v46 = vpop.eup %1027 }
 0x1d5   :  { %678 = vst [vmem:[%s1331_s5 + $0x40] sm:$0xff] %v662_v43  ;;  %v633_v49 = vmul.f32 0.6931472, %v1028_v46 }
 0x1d6   :  { %v665_v47 = vmul.f32 0.22297041, %v702_v44  ;;  %v701_v48 = vadd.f32 5.081, %v627_v45 }
 0x1d7   :  { %v1030_v50 = vpop.eup %1029  ;;  %v704_v52 = vadd.f32 5.081, %v633_v49 }
 0x1d8   :  { %681 = vst [vmem:[%s1331_s5 + $0x58] sm:$0xff] %v665_v47  ;;  %v664_v51 = vmul.f32 0.22297041, %v701_v48  ;;  %v631_v53 = vmul.f32 0.6931472, %v1030_v50 }
 0x1d9   :  { %v1032_v54 = vpop.eup %1031  ;;  %v667_v55 = vmul.f32 0.22297041, %v704_v52 }
 0x1da   :  { %680 = vst [vmem:[%s1331_s5 + $0x50] sm:$0xff] %v664_v51  ;;  %v703_v56 = vadd.f32 5.081, %v631_v53  ;;  %v637_v57 = vmul.f32 0.6931472, %v1032_v54 }
 0x1db   :  { %v1034_v58 = vpop.eup %1033  ;;  %683 = vst [vmem:[%s1331_s5 + $0x68] sm:$0xff] %v667_v55 }
 0x1dc   :  { %v666_v59 = vmul.f32 0.22297041, %v703_v56  ;;  %v706_v60 = vadd.f32 5.081, %v637_v57  ;;  %v635_v61 = vmul.f32 0.6931472, %v1034_v58 }
 0x1de   :  { %682 = vst [vmem:[%s1331_s5 + $0x60] sm:$0xff] %v666_v59  ;;  %v669_v62 = vmul.f32 0.22297041, %v706_v60  ;;  %v705_v63 = vadd.f32 5.081, %v635_v61 }
 0x1e0   :  { %685 = vst [vmem:[%s1331_s5 + $0x78] sm:$0xff] %v669_v62  ;;  %v668_v0 = vmul.f32 0.22297041, %v705_v63 }
 0x1e2   :  { %684 = vst [vmem:[%s1331_s5 + $0x70] sm:$0xff] %v668_v0 }

// kernel: cavmae_forward.3
= control target key start
LH: loop header
LB: loop body
LE: loop exit
PB: predicated region body
PF: predicated region fallthrough
CT: control target
= control target key end

     0   :  { %13 = vsyncpa [#allocation4], 0  ;;  %s3495_s27 = smov 0   ;;  %s4001_s0 = inlined_call_operand.vmem [shape: f32[16,256], index: 0, kind: input, shape index: {}]   ;;  %s4002_s1 = inlined_call_operand.vmem [shape: bf16[256,128], index: 1, kind: input, shape index: {}]   ;;  %s4003_s2 = inlined_call_operand.vmem [shape: f32[8,128], index: 2, kind: input, shape index: {}]   ;;  %s4004_s3 = inlined_call_operand.vmem [shape: bf16[2,128,384], index: 3, kind: input, shape index: {}]   ;;  %s4005_s4 = inlined_call_operand.vmem [shape: bf16[2,128,128], index: 4, kind: input, shape index: {}]   ;;  %s4006_s5 = inlined_call_operand.vmem [shape: bf16[2,128,512], index: 5, kind: input, shape index: {}]   ;;  %s4007_s6 = inlined_call_operand.vmem [shape: bf16[2,512,128], index: 6, kind: input, shape index: {}]   ;;  %s4008_s7 = inlined_call_operand.vmem [shape: f32[2,16,512], index: 7, kind: input, shape index: {}]   ;;  %s4009_s8 = inlined_call_operand.hbm [shape: f32[16,128], index: 8, kind: output, shape index: {}]  }
   0x1 LB: > { %s3501_s28 = sadd.s32 4294967295, %s3439_s27   ;;  %p2780_p0 = scmp.ge.s32.totalorder %s3439_s27, 1  ;;  %s3439_s27 = sphi %s3495_s27, %s19_s27  }
   0x2   : > { %p298_p1 = scmp.lt.s32.totalorder %s3439_s27, 3 }
   0x4   : > { %p299_p2 = pnand %p2780_p0, %p298_p1 }
   0x5   : > { %p347_p3 = scmp.lt.s32.totalorder (!%p299_p2), %s3501_s28, 1  ;;  %p2790_p4 = scmp.ne.s32.totalorder (!%p299_p2), %s3501_s28, 0 }
   0x6   : > { %302 = sbr.rel (%p299_p2) target bundleno = 4431 (0x114f), region = 52 }
   0xb   : > { %s348_s29 = scalar_select %p347_p3, %s3501_s28, 1 }
   0xc   : > { %376 = sbr.rel (%p2790_p4) target bundleno = 254 (0xfe), region = 56 }
   0xd   : > { %s3180_s30 = smul.u32 192, %s348_s29  ;;  %s2924_s9 = sshll.u32 %s348_s29, 6 }
   0xe   : > { %s3510_s12 = scalar_lea.vmem %s4005_s4, %s2924_s9  ;;  %s2925_s13 = sshll.u32 %s348_s29, 8 }
   0xf   : > { %s3515_s16 = scalar_lea.vmem %s4004_s3, %s3180_s30  ;;  %s3520_s19 = scalar_lea.vmem %s4006_s5, %s2925_s13 }
  0x10   : > { %s3525_s22 = scalar_lea.vmem %s4007_s6, %s2925_s13  ;;  %s3530_s25 = scalar_lea.vmem %s4008_s7, %s2924_s9 }
  0x11   : > { %v3204_v0 = vld [vmem:[%s4002_s1 + $0x78] sm:$0xff]   ;;  %v3206_v2 = vld [vmem:[%s4002_s1 + $0x70] sm:$0xff]   ;;  %v3208_v4 = vld [vmem:[%s4002_s1 + $0x68] sm:$0xff]  }
  0x12   : > { %v3205_v1 = vld [vmem:[%s4002_s1 + $0x38] sm:$0xff]   ;;  %2928 = vmatprep.subr.bf16.mxu0 %v3204_v0  ;;  %v3207_v3 = vld [vmem:[%s4002_s1 + $0x30] sm:$0xff]   ;;  %v3209_v5 = vld [vmem:[%s4002_s1 + $0x28] sm:$0xff]  }
  0x13   : > { %2929 = vmatpush3.bf16.msra.mxu0 %v3205_v1  ;;  %v3210_v6 = vld [vmem:[%s4002_s1 + $0x60] sm:$0xff]   ;;  %v3212_v8 = vld [vmem:[%s4002_s1 + $0x58] sm:$0xff]   ;;  %v3214_v10 = vld [vmem:[%s4002_s1 + $0x50] sm:$0xff]  }
  0x14   : > { %2930 = vmatprep.subr.bf16.mxu0 %v3206_v2  ;;  %v3211_v7 = vld [vmem:[%s4002_s1 + $0x20] sm:$0xff]   ;;  %v3213_v9 = vld [vmem:[%s4002_s1 + $0x18] sm:$0xff]   ;;  %v378_v11 = vld [vmem:[%s4001_s0 + $0x8] sm:$0xff] }
  0x15   : > { %v380_v12 = vld [vmem:[%s4001_s0 + $0x18] sm:$0xff]  ;;  %v3215_v14 = vld [vmem:[%s4002_s1 + $0x10] sm:$0xff]   ;;  %v3216_v15 = vld [vmem:[%s4002_s1 + $0x48] sm:$0xff]  }
  0x16   : > { %v382_v13 = vpack.c.bf16 %v380_v12, %v378_v11  ;;  %v3217_v16 = vld [vmem:[%s4002_s1 + $0x8] sm:$0xff]   ;;  %v3218_v17 = vld [vmem:[%s4002_s1 + $0x40] sm:$0xff]   ;;  %v379_v20 = vld [vmem:[%s4001_s0 + $0x10] sm:$0xff] }
  0x17   : > { %2931 = vmatpush3.bf16.msra.mxu0 %v3207_v3  ;;  %v3219_v18 = vld [vmem:[%s4002_s1] sm:$0xff]  }
  0x18   : > { %2932 = vmatprep.subr.bf16.mxu0 %v3208_v4  ;;  %543 = vmatprep.mubr.bf16.mxu0 %v382_v13  ;;  %v377_v19 = vld [vmem:[%s4001_s0] sm:$0xff] }
  0x19   : > { %v381_v21 = vpack.c.bf16 %v379_v20, %v377_v19  ;;  %v552_v24 = vld [vmem:[%s4003_s2] sm:$0xff] }
  0x1b   : > { %2933 = vmatpush3.bf16.msra.mxu0 %v3209_v5 }
  0x1c   : > { %2934 = vmatprep.subr.bf16.mxu0 %v3210_v6 }
  0x1f   : > { %2935 = vmatpush3.bf16.msra.mxu0 %v3211_v7 }
  0x20   : > { %2936 = vmatprep.subr.bf16.mxu0 %v3212_v8 }
  0x23   : > { %2937 = vmatpush3.bf16.msra.mxu0 %v3213_v9 }
  0x24   : > { %2938 = vmatprep.subr.bf16.mxu0 %v3214_v10 }
  0x27   : > { %2939 = vmatpush3.bf16.msra.mxu0 %v3215_v14 }
  0x28   : > { %2940 = vmatprep.subr.bf16.mxu0 %v3216_v15 }
  0x2b   : > { %2941 = vmatpush3.bf16.msra.mxu0 %v3217_v16 }
  0x2c   : > { %2942 = vmatprep.subr.bf16.mxu0 %v3218_v17 }
  0x2f   : > { %2943 = vmatpush3.bf16.msra.mxu0 %v3219_v18 }
  0x32   : > { %544 = vmatmul.mubr.bf16.vlgmr.msra.gmra.mxu0 %v381_v21 }
  0xf2   : > { %v2944_v22 = vpop.f32.mrf.mxu0 }
  0xf4   : > { %v2945_v23 = vpop.f32.mrf.mxu0 }
  0xf5   : > { %v2946_v25 = vadd.f32 %v2945_v23, %v2944_v22 }
  0xf6   : > { %v2947_v26 = vpop.f32.mrf.mxu0 }
  0xf7   : > { %v553_v27 = vadd.f32 %v2946_v25, %v552_v24 }
  0xf8   : > { %v2948_v28 = vpop.f32.mrf.mxu0 }
  0xf9   : > { %555 = vst [vmem:[#allocation3] sm:$0xff] %v553_v27  ;;  %v2949_v29 = vadd.f32 %v2948_v28, %v2947_v26 }
  0xfb   : > { %v554_v30 = vadd.f32 %v2949_v29, %v552_v24 }
  0xfd   : > { %556 = vst [vmem:[#allocation3 + $0x8] sm:$0xff] %v554_v30 }
  0xfe PF: > { %v3597_v33 = vld [vmem:[%s3530_s25 + $0x20] sm:$0xff]  ;;  %v3220_v34 = vld [vmem:[%s3515_s16 + $0xac] ss:$12 sps:$4 sm:$0xff]   ;;  %v3222_v35 = vld [vmem:[%s3515_s16 + $0xa8] ss:$12 sps:$4 sm:$0xff]   ;;  %v3441_v36 = vmov 0.0   ;;  %v587_v10 = vlaneseq }
  0xff   : > { %3044 = vmatprep.subr.bf16.mxu1 %v3441_v36  ;;  %v3223_v37 = vld [vmem:[%s3515_s16 + $0xb0] ss:$12 sps:$4 sm:$0xff]   ;;  %772 = vmatprep.subr.bf16.mxu0 %v3220_v34  ;;  %v3224_v46 = vld [vmem:[%s3515_s16 + $0x94] ss:$12 sps:$4 sm:$0xff]   ;;  %v3227_v48 = vld [vmem:[%s3515_s16 + $0x98] ss:$12 sps:$4 sm:$0xff]  }
 0x100   : > { %v562_v31 = vld [vmem:[#allocation3] sm:$0xff]  ;;  %773 = vmatpush1.bf16.msra.mxu0 %v3222_v35  ;;  %3045 = vmatpush3.bf16.msra.mxu1 %v3223_v37  ;;  %v3228_v49 = vld [vmem:[%s3515_s16 + $0x7c] ss:$12 sps:$4 sm:$0xff]   ;;  %v3230_v50 = vld [vmem:[%s3515_s16 + $0x78] ss:$12 sps:$4 sm:$0xff]   ;;  %v3442_v59 = vmov 0  }
 0x101   : > { %564 = vadd.xlane.f32.xlu0 %v562_v31  ;;  %3046 = vmatprep.subr.bf16.mxu1 %v3441_v36  ;;  %v3226_v47 = vld [vmem:[%s3515_s16 + $0x90] ss:$12 sps:$4 sm:$0xff]   ;;  %v3231_v51 = vld [vmem:[%s3515_s16 + $0x80] ss:$12 sps:$4 sm:$0xff]   ;;  %v3235_v54 = vld [vmem:[%s3515_s16 + $0x68] ss:$12 sps:$4 sm:$0xff]  }
 0x102   : > { %774 = vmatprep.subr.bf16.mxu0 %v3224_v46  ;;  %v3232_v52 = vld [vmem:[%s3515_s16 + $0x64] ss:$12 sps:$4 sm:$0xff]   ;;  %v3234_v53 = vld [vmem:[%s3515_s16 + $0x60] ss:$12 sps:$4 sm:$0xff]   ;;  %v3238_v56 = vld [vmem:[%s3515_s16 + $0x48] ss:$12 sps:$4 sm:$0xff]   ;;  %804 = vmatprep.mubr.bf16.mxu0 %v3442_v59 }
 0x103   : > { %v3236_v55 = vld [vmem:[%s3515_s16 + $0x4c] ss:$12 sps:$4 sm:$0xff]   ;;  %v3239_v57 = vld [vmem:[%s3515_s16 + $0x50] ss:$12 sps:$4 sm:$0xff]   ;;  %v3240_v58 = vld [vmem:[%s3515_s16 + $0x34] ss:$12 sps:$4 sm:$0xff]  }
 0x104   : > { %v563_v32 = vld [vmem:[#allocation3 + $0x8] sm:$0xff]  ;;  %775 = vmatpush1.bf16.msra.mxu0 %v3226_v47  ;;  %3047 = vmatpush3.bf16.msra.mxu1 %v3227_v48  ;;  %vm3443_vm0 = vmmov 0   ;;  %v3247_v0 = vld [vmem:[%s3515_s16 + $0x20] ss:$12 sps:$4 sm:$0xff]   ;;  %v3248_v1 = vld [vmem:[%s3515_s16 + $0x4] ss:$12 sps:$4 sm:$0xff]  }
 0x105   : > { %566 = vadd.xlane.f32.xlu0 %v563_v32  ;;  %3048 = vmatprep.subr.bf16.mxu1 %v3441_v36  ;;  %v3242_v60 = vld [vmem:[%s3515_s16 + $0x30] ss:$12 sps:$4 sm:$0xff]   ;;  %v3243_v61 = vld [vmem:[%s3515_s16 + $0x38] ss:$12 sps:$4 sm:$0xff]   ;;  %v3250_v2 = vld [vmem:[%s3515_s16] ss:$12 sps:$4 sm:$0xff]  }
 0x106   : > { %776 = vmatprep.subr.bf16.mxu0 %v3228_v49  ;;  %3060 = vmatprep.mubr.msk.bf16.mxu1 %vm3443_vm0, %v3441_v36  ;;  %v3244_v62 = vld [vmem:[%s3515_s16 + $0x1c] ss:$12 sps:$4 sm:$0xff]   ;;  %v3246_v63 = vld [vmem:[%s3515_s16 + $0x18] ss:$12 sps:$4 sm:$0xff]   ;;  %v3644_v11 = vshrl.u32 %v587_v10, 7  ;;  %v559_v30 = vld [vmem:[%s3530_s25 + $0x10] sm:$0xff] }
 0x107   : > { %v3251_v3 = vld [vmem:[%s3515_s16 + $0x8] ss:$12 sps:$4 sm:$0xff]   ;;  %v3648_v13 = vld [vmem:[%s3530_s25] sm:$0xff]  ;;  %vm864_vm1 = vcmask 261120   ;;  %vm985_vm2 = vcmask 1043456   ;;  %vm957_vm3 = vcmask 64512  }
 0x108   : > { %777 = vmatpush1.bf16.msra.mxu0 %v3230_v50  ;;  %3049 = vmatpush3.bf16.msra.mxu1 %v3231_v51  ;;  %v589_v12 = vsub.s32 0, %v3644_v11  ;;  %v595_v17 = vsub.s32 1, %v3644_v11  ;;  %v558_v26 = vld [vmem:[%s3530_s25 + $0x8] sm:$0xff]  ;;  %v634_v27 = vsub.s32 2, %v3644_v11  ;;  %s3444_s16 = smov 96   ;;  %s3445_s21 = smov 64  }
 0x109   : > { %3050 = vmatprep.subr.bf16.mxu1 %v3441_v36  ;;  %778 = vmatprep.subr.bf16.mxu0 %v3232_v52  ;;  %s3446_s23 = smov 32   ;;  %vm1311_vm4 = vcmask 523520   ;;  %vm1542_vm5 = vcmask 785920   ;;  %vm1773_vm6 = vcmask 1048320   ;;  %p2919_p5 = scmp.ne.s32.totalorder %s3501_s28, 1 }
 0x10a   : > { %v590_v16 = vrot.slane %v3648_v13, %v589_v12  ;;  %v596_v21 = vrot.slane %v3648_v13, %v595_v17  ;;  %v639_v28 = vrot.slane %v558_v26, %v634_v27  ;;  %v643_v37 = vrot.slane %v559_v30, %v634_v27 }
 0x10c   : > { %779 = vmatpush1.bf16.msra.mxu0 %v3234_v53  ;;  %3051 = vmatpush3.bf16.msra.mxu1 %v3235_v54 }
 0x10d   : > { %780 = vmatprep.subr.bf16.mxu0 %v3236_v55  ;;  %3052 = vmatprep.subr.bf16.mxu1 %v3441_v36 }
 0x110   : > { %781 = vmatpush1.bf16.msra.mxu0 %v3238_v56  ;;  %3053 = vmatpush3.bf16.msra.mxu1 %v3239_v57 }
 0x111   : > { %782 = vmatprep.subr.bf16.mxu0 %v3240_v58  ;;  %3054 = vmatprep.subr.bf16.mxu1 %v3441_v36 }
 0x114   : > { %783 = vmatpush1.bf16.msra.mxu0 %v3242_v60  ;;  %3055 = vmatpush3.bf16.msra.mxu1 %v3243_v61 }
 0x115   : > { %784 = vmatprep.subr.bf16.mxu0 %v3244_v62  ;;  %3056 = vmatprep.subr.bf16.mxu1 %v3441_v36 }
 0x118   : > { %785 = vmatpush1.bf16.msra.mxu0 %v3246_v63  ;;  %3057 = vmatpush3.bf16.msra.mxu1 %v3247_v0 }
 0x119   : > { %786 = vmatprep.subr.bf16.mxu0 %v3248_v1  ;;  %3058 = vmatprep.subr.bf16.mxu1 %v3441_v36 }
 0x11c   : > { %787 = vmatpush1.bf16.msra.mxu0 %v3250_v2  ;;  %3059 = vmatpush3.bf16.msra.mxu1 %v3251_v3 }
 0x11d   : > { %3064 = vmatprep.subr.bf16.mxu1 %v3441_v36  ;;  %3088 = vmatprep.subr.bf16.mxu0 %v3441_v36 }
 0x18a   : > { %v565_v38 = vpop.xlane.xlu0 %564 }
 0x18b   : > { %v569_v39 = vmul.f32 0.0078125, %v565_v38 }
 0x18d   : > { %v3604_v40 = vsub.f32 %v562_v31, %v569_v39 }
 0x18e   : > { %v567_v41 = vpop.xlane.xlu0 %566 }
 0x18f   : > { %v570_v42 = vmul.f32 0.0078125, %v567_v41  ;;  %v573_v43 = vmul.f32 %v3604_v40, %v3604_v40 }
 0x191   : > { %v3608_v44 = vsub.f32 %v563_v32, %v570_v42  ;;  %575 = vadd.xlane.f32.xlu1 %v573_v43  ;;  %v635_v32 = vrot.slane %v3648_v13, %v634_v27 }
 0x193   : > { %v574_v45 = vmul.f32 %v3608_v44, %v3608_v44 }
 0x195   : > { %577 = vadd.xlane.f32.xlu1 %v574_v45 }
 0x21a   : > { %v576_v4 = vpop.xlane.xlu1 %575 }
 0x21b   : > { %v579_v5 = vmul.f32 0.0078125, %v576_v4 }
 0x21d   : > { %v581_v6 = vadd.f32 1e-06, %v579_v5 }
 0x21e   : > { %v578_v7 = vpop.xlane.xlu1 %577 }
 0x21f   : > { %3340 = vrsqrt.f32 %v581_v6  ;;  %v580_v8 = vmul.f32 0.0078125, %v578_v7 }
 0x221   : > { %v582_v9 = vadd.f32 1e-06, %v580_v8 }
 0x223   : > { %3342 = vrsqrt.f32 %v582_v9 }
 0x22c   : > { %v3341_v14 = vpop.eup %3340 }
 0x22d   : > { %v585_v15 = vmul.f32 %v3341_v14, %v3604_v40 }
 0x22f   : > { %v591_v20 = vmul.f32 %v590_v16, %v585_v15 }
 0x230   : > { %v3343_v18 = vpop.eup %3342 }
 0x231   : > { %v586_v19 = vmul.f32 %v3343_v18, %v3608_v44  ;;  %v597_v23 = vadd.f32 %v596_v21, %v591_v20 }
 0x233   : > { %v592_v22 = vmul.f32 %v590_v16, %v586_v19 }
 0x235   : > { %v598_v24 = vadd.f32 %v596_v21, %v592_v22 }
 0x237   : > { %v599_v25 = vpack.c.bf16 %v598_v24, %v597_v23 }
 0x239   : > { %805 = vmatmul.mubr.bf16.vlgmr.msra.gmra.mxu0 %v599_v25  ;;  %3061 = vmatmul.mubr.bf16.vlgmr.msra.gmra.mxu1 %v599_v25 }
 0x23a   : > { %3066 = vmatprep.mubr.msk.bf16.mxu1 %vm3443_vm0, %v3441_v36  ;;  %3090 = vmatprep.mubr.msk.bf16.mxu0 %vm3443_vm0, %v3441_v36 }
 0x2f9   : > { %v806_v29 = vpop.f32.mrf.mxu0  ;;  %v849_v31 = vpop.f32.mrf.mxu1 }
 0x2fa   : > { %v807_v41 = vadd.f32 %v806_v29, %v635_v32  ;;  %v850_v52 = vadd.f32 %v849_v31, %v643_v37 }
 0x2fb   : > { %v808_v34 = vpop.f32.mrf.mxu0  ;;  %v3062_v35 = vpop.f32.mrf.mxu1 }
 0x2fc   : > { %v809_v38 = vadd.f32 %v808_v34, %v639_v28  ;;  %v856_v48 = vmul.f32 0.17677669, %v807_v41  ;;  %v3685_v55 = vpack.c.bf16 %v850_v52, %v850_v52 }
 0x2fd   : > { %v810_v39 = vpop.f32.mrf.mxu0  ;;  %v852_v40 = vpop.f32.mrf.mxu1 }
 0x2fe   : > { %v3667_v42 = vpack.c.bf16 %v809_v38, %v809_v38  ;;  %v3669_v43 = vadd.f32 %v852_v40, %v643_v37  ;;  %v3676_v50 = vpack.c.bf16 %v856_v48, %v856_v48  ;;  %v811_v51 = vadd.f32 %v810_v39, %v635_v32 }
 0x2ff   : > { %v812_v44 = vpop.f32.mrf.mxu0  ;;  %v3063_v45 = vpop.f32.mrf.mxu1  ;;  %v987_v57 = vsel %vm985_vm2, %v3685_v55, 0 }
 0x300   : > { %v813_v46 = vadd.f32 %v812_v44, %v639_v28  ;;  %v869_v47 = vsel %vm864_vm1, %v3667_v42, 0  ;;  %v857_v54 = vmul.f32 0.17677669, %v811_v51  ;;  %v3715_v26 = vpack.c.bf16 %v3669_v43, %v3669_v43 }
 0x301   : > { %3065 = vmatpush3.bf16.xpose.msra.mxu1 %v869_v47 }
 0x302   : > { %3070 = vmatprep.subr.bf16.mxu1 %v3441_v36  ;;  %v3674_v49 = vpack.c.bf16 %v813_v46, %v813_v46  ;;  %v3687_v56 = vpack.c.bf16 %v857_v54, %v857_v54  ;;  %v1033_v29 = vsel %vm985_vm2, %v3715_v26, 0 }
 0x304   : > { %v915_v53 = vsel %vm864_vm1, %v3674_v49, 0 }
 0x308   : > { %3067 = vmatmul.mubr.msk.bf16.vlgmr.msra.gmra.mxu1 %vm864_vm1, %v3676_v50 }
 0x309   : > { %3071 = vmatpush3.bf16.xpose.msra.mxu1 %v915_v53  ;;  %3072 = vmatprep.mubr.msk.bf16.mxu1 %vm3443_vm0, %v3441_v36 }
 0x30a   : > { %3076 = vmatprep.subr.bf16.mxu1 %v3441_v36 }
 0x310   : > { %3073 = vmatmul.mubr.msk.bf16.vlgmr.msra.gmra.mxu1 %vm864_vm1, %v3687_v56 }
 0x311   : > { %3077 = vmatpush3.bf16.msra.mxu1 %v987_v57  ;;  %3078 = vmatprep.mubr.msk.bf16.mxu1 %vm3443_vm0, %v3441_v36 }
 0x312   : > { %3082 = vmatprep.subr.bf16.mxu1 %v3441_v36 }
 0x3c8   : > { %v905_v58 = vpop.f32.mrf.mxu1 }
 0x3c9   : > { %v958_v60 = vsel %vm957_vm3, %v905_v58, -inf }
 0x3ca   : > { %959 = vmax.xlane.f32.xlu0 %v958_v60  ;;  %v3068_v61 = vpop.f32.mrf.mxu1 }
 0x3cc   : > { %v908_v62 = vpop.f32.mrf.mxu1 }
 0x3ce   : > { %v3069_v63 = vpop.f32.mrf.mxu1 }
 0x3d0   : > { %v951_v0 = vpop.f32.mrf.mxu1 }
 0x3d1   : > { %v961_v1 = vsel %vm957_vm3, %v951_v0, -inf }
 0x3d2   : > { %962 = vmax.xlane.f32.xlu1 %v961_v1  ;;  %v3074_v2 = vpop.f32.mrf.mxu1 }
 0x3d4   : > { %v954_v3 = vpop.f32.mrf.mxu1 }
 0x3d6   : > { %v3075_v4 = vpop.f32.mrf.mxu1 }
 0x3e3   : > { %1133 = vrot.lane.b32.xlu1 %v3674_v49, %s3444_s16 }
 0x453   : > { %v960_v5 = vpop.xlane.xlu0 %959 }
 0x454   : > { %v964_v6 = vsub.f32 %v905_v58, %v960_v5 }
 0x456   : > { %v966_v7 = vmul.f32 1.442695, %v964_v6 }
 0x458   : > { %3344 = vpow2.f32 %v966_v7 }
 0x45b   : > { %v963_v8 = vpop.xlane.xlu1 %962 }
 0x45c   : > { %v965_v9 = vsub.f32 %v951_v0, %v963_v8 }
 0x45e   : > { %v968_v10 = vmul.f32 1.442695, %v965_v9 }
 0x45f   : > { %v1134_v20 = vpop.permute.xlu1 %1133 }
 0x460   : > { %3346 = vpow2.f32 %v968_v10  ;;  %v1139_v34 = vsel %vm864_vm1, %v1134_v20, 0 }
 0x465   : > { %v3345_v14 = vpop.eup %3344 }
 0x466   : > { %v970_v15 = vsel %vm957_vm3, %v3345_v14, 0.0 }
 0x467   : > { %971 = vadd.xlane.f32.xlu0 %v970_v15 }
 0x46d   : > { %v3347_v16 = vpop.eup %3346 }
 0x46e   : > { %v973_v18 = vsel %vm957_vm3, %v3347_v16, 0.0 }
 0x46f   : > { %974 = vadd.xlane.f32.xlu1 %v973_v18 }
 0x47d   : > { %1081 = vrot.lane.b32.xlu0 %v3667_v42, %s3444_s16 }
 0x480   : > { %1078 = vrot.lane.b32.xlu1 %v3676_v50, %s3444_s16 }
 0x484   : > { %1130 = vrot.lane.b32.xlu1 %v3687_v56, %s3444_s16 }
 0x4f0   : > { %v972_v19 = vpop.xlane.xlu0 %971 }
 0x4f1   : > { %3348 = vrcp.f32 %v972_v19 }
 0x4f4   : > { %v1082_v21 = vpop.permute.xlu0 %1081 }
 0x4f5   : > { %v1087_v22 = vsel %vm864_vm1, %v1082_v21, 0 }
 0x4f6   : > { %3089 = vmatpush3.bf16.xpose.msra.mxu0 %v1087_v22 }
 0x4f7   : > { %3100 = vmatprep.subr.bf16.mxu0 %v3441_v36 }
 0x4f8   : > { %v975_v23 = vpop.xlane.xlu1 %974 }
 0x4f9   : > { %3350 = vrcp.f32 %v975_v23 }
 0x4fc   : > { %v1079_v24 = vpop.permute.xlu1 %1078 }
 0x4fd   : > { %3091 = vmatmul.mubr.msk.bf16.vlgmr.msra.gmra.mxu0 %vm864_vm1, %v1079_v24 }
 0x4fe   : > { %v3349_v25 = vpop.eup %3348  ;;  %3102 = vmatprep.mubr.msk.bf16.mxu0 %vm3443_vm0, %v3441_v36 }
 0x4ff   : > { %v978_v27 = vmul.f32 %v3349_v25, %v3345_v14 }
 0x500   : > { %v1131_v35 = vpop.permute.xlu1 %1130 }
 0x501   : > { %v980_v28 = vpack.c.bf16 %v978_v27, %v978_v27 }
 0x503   : > { %3079 = vmatmul.mubr.msk.bf16.vlgmr.msra.gmra.mxu1 %vm957_vm3, %v980_v28 }
 0x504   : > { %3083 = vmatpush3.bf16.msra.mxu1 %v1033_v29  ;;  %3084 = vmatprep.mubr.msk.bf16.mxu1 %vm3443_vm0, %v3441_v36 }
 0x505   : > { %3094 = vmatprep.subr.bf16.mxu1 %v3441_v36 }
 0x506   : > { %v3351_v30 = vpop.eup %3350 }
 0x507   : > { %v979_v31 = vmul.f32 %v3351_v30, %v3347_v16 }
 0x509   : > { %v981_v32 = vpack.c.bf16 %v979_v31, %v979_v31 }
 0x50b   : > { %3085 = vmatmul.mubr.msk.bf16.vlgmr.msra.gmra.mxu1 %vm957_vm3, %v981_v32 }
 0x50c   : > { %3095 = vmatpush3.bf16.xpose.msra.mxu1 %v1139_v34  ;;  %3096 = vmatprep.mubr.msk.bf16.mxu1 %vm3443_vm0, %v3441_v36 }
 0x50d   : > { %3106 = vmatprep.subr.bf16.mxu1 %v3441_v36 }
 0x513   : > { %3097 = vmatmul.mubr.msk.bf16.vlgmr.msra.gmra.mxu1 %vm864_vm1, %v1131_v35 }
 0x514   : > { %3108 = vmatprep.mubr.msk.bf16.mxu1 %vm3443_vm0, %v3441_v36 }
 0x5bd   : > { %v1123_v37 = vpop.f32.mrf.mxu0 }
 0x5be   : > { %v1181_v38 = vsel %vm957_vm3, %v1123_v37, -inf }
 0x5bf   : > { %1182 = vmax.xlane.f32.xlu0 %v1181_v38  ;;  %v3092_v39 = vpop.f32.mrf.mxu0 }
 0x5c1   : > { %v1126_v40 = vpop.f32.mrf.mxu0 }
 0x5c3   : > { %v1023_v41 = vpop.f32.mrf.mxu1  ;;  %v3093_v43 = vpop.f32.mrf.mxu0 }
 0x5c4   : > { %1075 = vst.msk [vmem:[#allocation2] sm:$0xff] %vm864_vm1, %v1023_v41 }
 0x5c5   : > { %v3080_v44 = vpop.f32.mrf.mxu1 }
 0x5c7   : > { %v1026_v45 = vpop.f32.mrf.mxu1 }
 0x5c9   : > { %v3081_v46 = vpop.f32.mrf.mxu1 }
 0x5cb   : > { %v1069_v47 = vpop.f32.mrf.mxu1 }
 0x5cc   : > { %1076 = vst.msk [vmem:[#allocation2 + $0x8] sm:$0xff] %vm864_vm1, %v1069_v47 }
 0x5cd   : > { %v3086_v48 = vpop.f32.mrf.mxu1 }
 0x5cf   : > { %v1072_v51 = vpop.f32.mrf.mxu1 }
 0x5d1   : > { %v3087_v52 = vpop.f32.mrf.mxu1 }
 0x5d3   : > { %v1175_v53 = vpop.f32.mrf.mxu1 }
 0x5d4   : > { %v1184_v54 = vsel %vm957_vm3, %v1175_v53, -inf }
 0x5d5   : > { %1185 = vmax.xlane.f32.xlu1 %v1184_v54  ;;  %v3098_v57 = vpop.f32.mrf.mxu1 }
 0x5d7   : > { %v1178_v58 = vpop.f32.mrf.mxu1 }
 0x5d9   : > { %v3099_v60 = vpop.f32.mrf.mxu1 }
 0x5e6   : > { %1255 = vrot.lane.b32.xlu1 %v3715_v26, %s3444_s16 }
 0x5ea   : > { %1316 = vrot.lane.b32.xlu1 %v3667_v42, %s3445_s21 }
 0x5ee   : > { %1366 = vrot.lane.b32.xlu1 %v3674_v49, %s3445_s21 }
 0x5f2   : > { %1364 = vrot.lane.b32.xlu1 %v3687_v56, %s3445_s21 }
 0x648   : > { %v1183_v61 = vpop.xlane.xlu0 %1182 }
 0x649   : > { %v1187_v62 = vsub.f32 %v1123_v37, %v1183_v61 }
 0x64b   : > { %v1189_v63 = vmul.f32 1.442695, %v1187_v62 }
 0x64d   : > { %3352 = vpow2.f32 %v1189_v63 }
 0x65a   : > { %v3353_v0 = vpop.eup %3352 }
 0x65b   : > { %v1193_v1 = vsel %vm957_vm3, %v3353_v0, 0.0 }
 0x65c   : > { %1194 = vadd.xlane.f32.xlu0 %v1193_v1 }
 0x65e   : > { %v1186_v2 = vpop.xlane.xlu1 %1185 }
 0x65f   : > { %v1188_v3 = vsub.f32 %v1175_v53, %v1186_v2 }
 0x661   : > { %v1191_v4 = vmul.f32 1.442695, %v1188_v3 }
 0x662   : > { %v1256_v5 = vpop.permute.xlu1 %1255 }
 0x663   : > { %3354 = vpow2.f32 %v1191_v4  ;;  %v1261_v6 = vsel %vm985_vm2, %v1256_v5, 0 }
 0x664   : > { %3107 = vmatpush3.bf16.msra.mxu1 %v1261_v6 }
 0x665   : > { %3118 = vmatprep.subr.bf16.mxu1 %v3441_v36 }
 0x666   : > { %v1317_v19 = vpop.permute.xlu1 %1316 }
 0x667   : > { %v1322_v21 = vsel %vm864_vm1, %v1317_v19, 0 }
 0x66a   : > { %v1367_v24 = vpop.permute.xlu1 %1366 }
 0x66b   : > { %v1372_v28 = vsel %vm864_vm1, %v1367_v24, 0 }
 0x66e   : > { %v1365_v29 = vpop.permute.xlu1 %1364 }
 0x670   : > { %v3355_v7 = vpop.eup %3354 }
 0x671   : > { %v1196_v8 = vsel %vm957_vm3, %v3355_v7, 0.0 }
 0x672   : > { %1197 = vadd.xlane.f32.xlu0 %v1196_v8 }
 0x688   : > { %1206 = vrot.lane.b32.xlu0 %v3685_v55, %s3444_s16 }
 0x68c   : > { %1314 = vrot.lane.b32.xlu0 %v3676_v50, %s3445_s21 }
 0x6e5   : > { %v1195_v9 = vpop.xlane.xlu0 %1194 }
 0x6e6   : > { %3356 = vrcp.f32 %v1195_v9 }
 0x6f3   : > { %v3357_v10 = vpop.eup %3356 }
 0x6f4   : > { %v1201_v15 = vmul.f32 %v3357_v10, %v3353_v0 }
 0x6f6   : > { %v1203_v20 = vpack.c.bf16 %v1201_v15, %v1201_v15 }
 0x6fb   : > { %v1198_v14 = vpop.xlane.xlu0 %1197 }
 0x6fc   : > { %3358 = vrcp.f32 %v1198_v14 }
 0x6ff   : > { %v1207_v16 = vpop.permute.xlu0 %1206 }
 0x700   : > { %v1212_v18 = vsel %vm985_vm2, %v1207_v16, 0 }
 0x701   : > { %3101 = vmatpush3.bf16.msra.mxu0 %v1212_v18 }
 0x702   : > { %3112 = vmatprep.subr.bf16.mxu0 %v3441_v36 }
 0x703   : > { %v1315_v25 = vpop.permute.xlu0 %1314 }
 0x704   : > { %3103 = vmatmul.mubr.msk.bf16.vlgmr.msra.gmra.mxu0 %vm957_vm3, %v1203_v20 }
 0x705   : > { %3113 = vmatpush3.bf16.xpose.msra.mxu0 %v1322_v21  ;;  %3114 = vmatprep.mubr.msk.bf16.mxu0 %vm3443_vm0, %v3441_v36 }
 0x706   : > { %3124 = vmatprep.subr.bf16.mxu0 %v3441_v36 }
 0x709   : > { %v3359_v22 = vpop.eup %3358 }
 0x70a   : > { %v1202_v23 = vmul.f32 %v3359_v22, %v3355_v7 }
 0x70c   : > { %3115 = vmatmul.mubr.msk.bf16.vlgmr.msra.gmra.mxu0 %vm864_vm1, %v1315_v25  ;;  %v1204_v27 = vpack.c.bf16 %v1202_v23, %v1202_v23 }
 0x70d   : > { %3126 = vmatprep.mubr.msk.bf16.mxu0 %vm3443_vm0, %v3441_v36 }
 0x70e   : > { %3109 = vmatmul.mubr.msk.bf16.vlgmr.msra.gmra.mxu1 %vm957_vm3, %v1204_v27 }
 0x70f   : > { %3119 = vmatpush3.bf16.xpose.msra.mxu1 %v1372_v28  ;;  %3120 = vmatprep.mubr.msk.bf16.mxu1 %vm3443_vm0, %v3441_v36 }
 0x710   : > { %3130 = vmatprep.subr.bf16.mxu1 %v3441_v36 }
 0x716   : > { %3121 = vmatmul.mubr.msk.bf16.vlgmr.msra.gmra.mxu1 %vm864_vm1, %v1365_v29 }
 0x717   : > { %3132 = vmatprep.mubr.msk.bf16.mxu1 %vm3443_vm0, %v3441_v36 }
 0x7c4   : > { %v3769_v30 = vpop.f32.mrf.mxu0 }
 0x7c6   : > { %v3104_v31 = vpop.f32.mrf.mxu0 }
 0x7c8   : > { %v1251_v32 = vpop.f32.mrf.mxu0 }
 0x7ca   : > { %v3105_v34 = vpop.f32.mrf.mxu0 }
 0x7cc   : > { %v1358_v35 = vpop.f32.mrf.mxu0 }
 0x7cd   : > { %v1414_v37 = vsel %vm957_vm3, %v1358_v35, -inf }
 0x7ce   : > { %1415 = vmax.xlane.f32.xlu0 %v1414_v37  ;;  %v3772_v38 = vpop.f32.mrf.mxu1  ;;  %v3116_v39 = vpop.f32.mrf.mxu0 }
 0x7d0   : > { %v3110_v40 = vpop.f32.mrf.mxu1  ;;  %v1361_v41 = vpop.f32.mrf.mxu0 }
 0x7d2   : > { %v1300_v43 = vpop.f32.mrf.mxu1  ;;  %v3117_v44 = vpop.f32.mrf.mxu0 }
 0x7d4   : > { %v3111_v45 = vpop.f32.mrf.mxu1 }
 0x7d6   : > { %v1408_v46 = vpop.f32.mrf.mxu1 }
 0x7d7   : > { %v1417_v47 = vsel %vm957_vm3, %v1408_v46, -inf }
 0x7d8   : > { %1418 = vmax.xlane.f32.xlu1 %v1417_v47  ;;  %v3122_v48 = vpop.f32.mrf.mxu1 }
 0x7da   : > { %v1411_v51 = vpop.f32.mrf.mxu1 }
 0x7dc   : > { %v3123_v52 = vpop.f32.mrf.mxu1 }
 0x7e9   : > { %1486 = vrot.lane.b32.xlu1 %v3715_v26, %s3445_s21 }
 0x7ed   : > { %1547 = vrot.lane.b32.xlu1 %v3667_v42, %s3446_s23 }
 0x7f1   : > { %1597 = vrot.lane.b32.xlu1 %v3674_v49, %s3446_s23 }
 0x7f5   : > { %1595 = vrot.lane.b32.xlu1 %v3687_v56, %s3446_s23 }
 0x857   : > { %v1416_v53 = vpop.xlane.xlu0 %1415 }
 0x858   : > { %v1420_v54 = vsub.f32 %v1358_v35, %v1416_v53 }
 0x85a   : > { %v1422_v57 = vmul.f32 1.442695, %v1420_v54 }
 0x85c   : > { %3360 = vpow2.f32 %v1422_v57 }
 0x861   : > { %v1419_v58 = vpop.xlane.xlu1 %1418 }
 0x862   : > { %v1421_v60 = vsub.f32 %v1408_v46, %v1419_v58 }
 0x864   : > { %v1424_v61 = vmul.f32 1.442695, %v1421_v60 }
 0x865   : > { %v1487_v62 = vpop.permute.xlu1 %1486 }
 0x866   : > { %3362 = vpow2.f32 %v1424_v61  ;;  %v1492_v63 = vsel %vm985_vm2, %v1487_v62, 0 }
 0x867   : > { %3131 = vmatpush3.bf16.msra.mxu1 %v1492_v63 }
 0x868   : > { %3142 = vmatprep.subr.bf16.mxu1 %v3441_v36 }
 0x869   : > { %v3361_v42 = vpop.eup %3360  ;;  %v1548_v7 = vpop.permute.xlu1 %1547 }
 0x86a   : > { %v1426_v49 = vsel %vm957_vm3, %v3361_v42, 0.0  ;;  %v1553_v9 = vsel %vm864_vm1, %v1548_v7, 0  ;;  %v3255_v7 = vld [vmem:[%s3510_s12 + $0x20] sm:$0xff]  }
 0x86b   : > { %1427 = vadd.xlane.f32.xlu0 %v1426_v49 }
 0x86d   : > { %v1598_v14 = vpop.permute.xlu1 %1597 }
 0x86e   : > { %v1603_v18 = vsel %vm864_vm1, %v1598_v14, 0 }
 0x871   : > { %v1596_v19 = vpop.permute.xlu1 %1595 }
 0x873   : > { %v3363_v0 = vpop.eup %3362 }
 0x874   : > { %v1429_v56 = vsel %vm957_vm3, %v3363_v0, 0.0 }
 0x875   : > { %1430 = vadd.xlane.f32.xlu0 %v1429_v56 }
 0x88b   : > { %1438 = vrot.lane.b32.xlu0 %v3685_v55, %s3445_s21 }
 0x88f   : > { %1545 = vrot.lane.b32.xlu0 %v3676_v50, %s3446_s23 }
 0x8f4   : > { %v1428_v1 = vpop.xlane.xlu0 %1427 }
 0x8f5   : > { %3364 = vrcp.f32 %v1428_v1 }
 0x8fe   : > { %v1431_v2 = vpop.xlane.xlu0 %1430 }
 0x8ff   : > { %3366 = vrcp.f32 %v1431_v2 }
 0x902   : > { %v3365_v3 = vpop.eup %3364  ;;  %v1439_v4 = vpop.permute.xlu0 %1438 }
 0x903   : > { %v1444_v5 = vsel %vm985_vm2, %v1439_v4, 0  ;;  %v1434_v6 = vmul.f32 %v3365_v3, %v3361_v42  ;;  %v3252_v4 = vld [vmem:[%s3510_s12 + $0x38] sm:$0xff]  }
 0x904   : > { %3125 = vmatpush3.bf16.msra.mxu0 %v1444_v5  ;;  %v3253_v5 = vld [vmem:[%s3510_s12 + $0x30] sm:$0xff]  }
 0x905   : > { %v1436_v8 = vpack.c.bf16 %v1434_v6, %v1434_v6  ;;  %3136 = vmatprep.subr.bf16.mxu0 %v3441_v36  ;;  %v3254_v6 = vld [vmem:[%s3510_s12 + $0x28] sm:$0xff]  }
 0x906   : > { %v1546_v15 = vpop.permute.xlu0 %1545 }
 0x907   : > { %3127 = vmatmul.mubr.msk.bf16.vlgmr.msra.gmra.mxu0 %vm957_vm3, %v1436_v8  ;;  %v3256_v8 = vld [vmem:[%s3510_s12 + $0x18] sm:$0xff]  }
 0x908   : > { %3137 = vmatpush3.bf16.xpose.msra.mxu0 %v1553_v9  ;;  %3138 = vmatprep.mubr.msk.bf16.mxu0 %vm3443_vm0, %v3441_v36  ;;  %v3257_v9 = vld [vmem:[%s3510_s12 + $0x10] sm:$0xff]  }
 0x909   : > { %3148 = vmatprep.subr.bf16.mxu0 %v3441_v36 }
 0x90c   : > { %v3367_v50 = vpop.eup %3366 }
 0x90d   : > { %v1435_v10 = vmul.f32 %v3367_v50, %v3363_v0  ;;  %v3258_v50 = vld [vmem:[%s3510_s12 + $0x8] sm:$0xff]  }
 0x90f   : > { %3139 = vmatmul.mubr.msk.bf16.vlgmr.msra.gmra.mxu0 %vm864_vm1, %v1546_v15  ;;  %v1437_v16 = vpack.c.bf16 %v1435_v10, %v1435_v10  ;;  %v3259_v15 = vld [vmem:[%s3510_s12] sm:$0xff]  }
 0x910   : > { %3150 = vmatprep.mubr.msk.bf16.mxu0 %vm3443_vm0, %v3441_v36 }
 0x911   : > { %3133 = vmatmul.mubr.msk.bf16.vlgmr.msra.gmra.mxu1 %vm957_vm3, %v1437_v16 }
 0x912   : > { %3143 = vmatpush3.bf16.xpose.msra.mxu1 %v1603_v18  ;;  %3144 = vmatprep.mubr.msk.bf16.mxu1 %vm3443_vm0, %v3441_v36 }
 0x913   : > { %3154 = vmatprep.subr.bf16.mxu1 %v3441_v36 }
 0x919   : > { %3145 = vmatmul.mubr.msk.bf16.vlgmr.msra.gmra.mxu1 %vm864_vm1, %v1596_v19 }
 0x91a   : > { %3156 = vmatprep.mubr.msk.bf16.mxu1 %vm3443_vm0, %v3441_v36 }
 0x9c7   : > { %v1480_v20 = vpop.f32.mrf.mxu0 }
 0x9c9   : > { %v3128_v21 = vpop.f32.mrf.mxu0 }
 0x9cb   : > { %v1483_v22 = vpop.f32.mrf.mxu0 }
 0x9cd   : > { %v3129_v23 = vpop.f32.mrf.mxu0 }
 0x9cf   : > { %v1589_v24 = vpop.f32.mrf.mxu0 }
 0x9d0   : > { %v1645_v25 = vsel %vm957_vm3, %v1589_v24, -inf }
 0x9d1   : > { %1646 = vmax.xlane.f32.xlu0 %v1645_v25  ;;  %v1528_v27 = vpop.f32.mrf.mxu1  ;;  %v3140_v28 = vpop.f32.mrf.mxu0 }
 0x9d3   : > { %v3134_v29 = vpop.f32.mrf.mxu1  ;;  %v1592_v31 = vpop.f32.mrf.mxu0 }
 0x9d5   : > { %v1531_v32 = vpop.f32.mrf.mxu1  ;;  %v3141_v34 = vpop.f32.mrf.mxu0 }
 0x9d7   : > { %v3135_v35 = vpop.f32.mrf.mxu1 }
 0x9d8   : > { %v3396_v35 = vld [vmem:[#allocation3] sm:$0xff] }
 0x9d9   : > { %v1639_v37 = vpop.f32.mrf.mxu1 }
 0x9da   : > { %v1648_v39 = vsel %vm957_vm3, %v1639_v37, -inf }
 0x9db   : > { %1649 = vmax.xlane.f32.xlu1 %v1648_v39  ;;  %v3146_v40 = vpop.f32.mrf.mxu1 }
 0x9dd   : > { %v1642_v41 = vpop.f32.mrf.mxu1 }
 0x9df   : > { %v3147_v43 = vpop.f32.mrf.mxu1 }
 0x9e0   : > { %v3397_v43 = vld [vmem:[#allocation3 + $0x8] sm:$0xff] }
 0x9ec   : > { %1717 = vrot.lane.b32.xlu1 %v3715_v26, %s3446_s23 }
 0x9f0   : > { %1305 = vrot.lane.b32.xlu1 %v3769_v30, %s3446_s23 }
 0x9f4   : > { %1307 = vrot.lane.b32.xlu1 %v3772_v38, %s3446_s23 }
 0x9f8   : > { %1538 = vrot.lane.b32.xlu1 %v1528_v27, %s3445_s21 }
 0xa5a   : > { %v1647_v44 = vpop.xlane.xlu0 %1646 }
 0xa5b   : > { %v1651_v45 = vsub.f32 %v1589_v24, %v1647_v44  ;;  %v3260_v44 = vld [vmem:[%s3520_s19 + $0xe0] ss:$16 sps:$4 sm:$0xff]  }
 0xa5d   : > { %v1653_v46 = vmul.f32 1.442695, %v1651_v45  ;;  %v3262_v45 = vld [vmem:[%s3520_s19 + $0xe4] ss:$16 sps:$4 sm:$0xff]  }
 0xa5f   : > { %3368 = vpow2.f32 %v1653_v46  ;;  %v3263_v46 = vld [vmem:[%s3520_s19 + $0xe8] ss:$16 sps:$4 sm:$0xff]  }
 0xa64   : > { %v1650_v47 = vpop.xlane.xlu1 %1649 }
 0xa65   : > { %v1652_v48 = vsub.f32 %v1639_v37, %v1650_v47  ;;  %v3265_v47 = vld [vmem:[%s3520_s19 + $0xec] ss:$16 sps:$4 sm:$0xff]  }
 0xa67   : > { %v1655_v51 = vmul.f32 1.442695, %v1652_v48 }
 0xa68   : > { %v1718_v52 = vpop.permute.xlu1 %1717 }
 0xa69   : > { %3370 = vpow2.f32 %v1655_v51  ;;  %v1723_v53 = vsel %vm985_vm2, %v1718_v52, 0 }
 0xa6a   : > { %3155 = vmatpush3.bf16.msra.mxu1 %v1723_v53 }
 0xa6b   : > { %2133 = vmatprep.subr.bf16.mxu1 %v3262_v45 }
 0xa6c   : > { %v3369_v26 = vpop.eup %3368  ;;  %v1306_v30 = vpop.permute.xlu1 %1305 }
 0xa6d   : > { %1312 = vst.msk [vmem:[#allocation2] sm:$0xff] %vm1311_vm4, %v1306_v30  ;;  %v1657_v38 = vsel %vm957_vm3, %v3369_v26, 0.0 }
 0xa6e   : > { %1658 = vadd.xlane.f32.xlu0 %v1657_v38 }
 0xa70   : > { %v1308_v54 = vpop.permute.xlu1 %1307 }
 0xa71   : > { %1313 = vst.msk [vmem:[#allocation2 + $0x8] sm:$0xff] %vm1311_vm4, %v1308_v54 }
 0xa74   : > { %v1539_v57 = vpop.permute.xlu1 %1538 }
 0xa75   : > { %1544 = vst.msk [vmem:[#allocation2 + $0x8] sm:$0xff] %vm1542_vm5, %v1539_v57  ;;  %v3268_v57 = vld [vmem:[%s3520_s19 + $0xc4] ss:$16 sps:$4 sm:$0xff]  }
 0xa76   : > { %v3371_v58 = vpop.eup %3370 }
 0xa77   : > { %v1660_v60 = vsel %vm957_vm3, %v3371_v58, 0.0 }
 0xa78   : > { %1661 = vadd.xlane.f32.xlu0 %v1660_v60  ;;  %v3266_v60 = vld [vmem:[%s3520_s19 + $0xc0] ss:$16 sps:$4 sm:$0xff]  }
 0xa8e   : > { %1669 = vrot.lane.b32.xlu0 %v3685_v55, %s3446_s23 }
 0xa92   : > { %1536 = vrot.lane.b32.xlu0 %v1480_v20, %s3445_s21 }
 0xaf7   : > { %v1659_v61 = vpop.xlane.xlu0 %1658 }
 0xaf8   : > { %3372 = vrcp.f32 %v1659_v61  ;;  %v3269_v61 = vld [vmem:[%s3520_s19 + $0xc8] ss:$16 sps:$4 sm:$0xff]  }
 0xb01   : > { %v1662_v62 = vpop.xlane.xlu0 %1661 }
 0xb02   : > { %3374 = vrcp.f32 %v1662_v62  ;;  %v3274_v62 = vld [vmem:[%s3520_s19 + $0xa4] ss:$16 sps:$4 sm:$0xff]  }
 0xb05   : > { %v3373_v63 = vpop.eup %3372  ;;  %v1670_v42 = vpop.permute.xlu0 %1669 }
 0xb06   : > { %v1675_v49 = vsel %vm985_vm2, %v1670_v42, 0  ;;  %v1665_v0 = vmul.f32 %v3373_v63, %v3369_v26  ;;  %v3277_v63 = vld [vmem:[%s3520_s19 + $0xac] ss:$16 sps:$4 sm:$0xff]   ;;  %v3272_v42 = vld [vmem:[%s3520_s19 + $0xa0] ss:$16 sps:$4 sm:$0xff]  }
 0xb07   : > { %3149 = vmatpush3.bf16.msra.mxu0 %v1675_v49  ;;  %v3275_v49 = vld [vmem:[%s3520_s19 + $0xa8] ss:$16 sps:$4 sm:$0xff]  }
 0xb08   : > { %v1667_v56 = vpack.c.bf16 %v1665_v0, %v1665_v0  ;;  %3160 = vmatprep.subr.bf16.mxu0 %v3441_v36  ;;  %v3278_v0 = vld [vmem:[%s3520_s19 + $0x80] ss:$16 sps:$4 sm:$0xff]  }
 0xb09   : > { %v1537_v1 = vpop.permute.xlu0 %1536 }
 0xb0a   : > { %1543 = vst.msk [vmem:[#allocation2] sm:$0xff] %vm1542_vm5, %v1537_v1  ;;  %3151 = vmatmul.mubr.msk.bf16.vlgmr.msra.gmra.mxu0 %vm957_vm3, %v1667_v56  ;;  %v3280_v56 = vld [vmem:[%s3520_s19 + $0x84] ss:$16 sps:$4 sm:$0xff]   ;;  %v3281_v1 = vld [vmem:[%s3520_s19 + $0x88] ss:$16 sps:$4 sm:$0xff]  }
 0xb0b   : > { %3176 = vmatprep.mubr.msk.bf16.mxu0 %vm3443_vm0, %v3441_v36  ;;  %3161 = vmatpush3.bf16.msra.mxu0 %v3252_v4  ;;  %v3284_v4 = vld [vmem:[%s3520_s19 + $0x60] ss:$16 sps:$4 sm:$0xff]  }
 0xb0c   : > { %3162 = vmatprep.subr.bf16.mxu0 %v3441_v36 }
 0xb0f   : > { %v3375_v55 = vpop.eup %3374  ;;  %3163 = vmatpush3.bf16.msra.mxu0 %v3253_v5  ;;  %v3287_v5 = vld [vmem:[%s3520_s19 + $0x68] ss:$16 sps:$4 sm:$0xff]  }
 0xb10   : > { %v1666_v2 = vmul.f32 %v3375_v55, %v3371_v58  ;;  %3164 = vmatprep.subr.bf16.mxu0 %v3441_v36  ;;  %v3271_v58 = vld [vmem:[%s3520_s19 + $0xcc] ss:$16 sps:$4 sm:$0xff]  }
 0xb11   : > { %v3283_v55 = vld [vmem:[%s3520_s19 + $0x8c] ss:$16 sps:$4 sm:$0xff]  }
 0xb12   : > { %v1668_v3 = vpack.c.bf16 %v1666_v2, %v1666_v2  ;;  %v3286_v2 = vld [vmem:[%s3520_s19 + $0x64] ss:$16 sps:$4 sm:$0xff]  }
 0xb13   : > { %3165 = vmatpush3.bf16.msra.mxu0 %v3254_v6  ;;  %v3292_v6 = vld [vmem:[%s3520_s19 + $0x44] ss:$16 sps:$4 sm:$0xff]  }
 0xb14   : > { %3157 = vmatmul.mubr.msk.bf16.vlgmr.msra.gmra.mxu1 %vm957_vm3, %v1668_v3  ;;  %3166 = vmatprep.subr.bf16.mxu0 %v3441_v36  ;;  %v3289_v3 = vld [vmem:[%s3520_s19 + $0x6c] ss:$16 sps:$4 sm:$0xff]  }
 0xb15   : > { %2165 = vmatprep.mubr.bf16.mxu1 %v3442_v59  ;;  %2134 = vmatpush1.bf16.msra.mxu1 %v3260_v44 }
 0xb16   : > { %2135 = vmatprep.subr.bf16.mxu1 %v3268_v57  ;;  %v3319_v57 = vld [vmem:[%s3525_s22 + $0xa8] sm:$0xff]  }
 0xb17   : > { %3167 = vmatpush3.bf16.msra.mxu0 %v3255_v7  ;;  %v3295_v7 = vld [vmem:[%s3520_s19 + $0x4c] ss:$16 sps:$4 sm:$0xff]  }
 0xb18   : > { %3168 = vmatprep.subr.bf16.mxu0 %v3441_v36 }
 0xb19   : > { %2136 = vmatpush1.bf16.msra.mxu1 %v3266_v60  ;;  %v3321_v60 = vld [vmem:[%s3525_s22 + $0xe0] sm:$0xff]  }
 0xb1a   : > { %2137 = vmatprep.subr.bf16.mxu1 %v3274_v62  ;;  %v3323_v62 = vld [vmem:[%s3525_s22 + $0xa0] sm:$0xff]  }
 0xb1b   : > { %3169 = vmatpush3.bf16.msra.mxu0 %v3256_v8  ;;  %v3290_v8 = vld [vmem:[%s3520_s19 + $0x40] ss:$16 sps:$4 sm:$0xff]  }
 0xb1c   : > { %3170 = vmatprep.subr.bf16.mxu0 %v3441_v36 }
 0xb1d   : > { %2138 = vmatpush1.bf16.msra.mxu1 %v3272_v42  ;;  %v3325_v42 = vld [vmem:[%s3525_s22 + $0xd8] sm:$0xff]  }
 0xb1e   : > { %2139 = vmatprep.subr.bf16.mxu1 %v3280_v56  ;;  %v3328_v56 = vld [vmem:[%s3525_s22 + $0x50] sm:$0xff]  }
 0xb1f   : > { %3171 = vmatpush3.bf16.msra.mxu0 %v3257_v9  ;;  %v3293_v9 = vld [vmem:[%s3520_s19 + $0x48] ss:$16 sps:$4 sm:$0xff]  }
 0xb20   : > { %3172 = vmatprep.subr.bf16.mxu0 %v3441_v36 }
 0xb21   : > { %2140 = vmatpush1.bf16.msra.mxu1 %v3278_v0  ;;  %v3327_v0 = vld [vmem:[%s3525_s22 + $0x98] sm:$0xff]  }
 0xb22   : > { %2141 = vmatprep.subr.bf16.mxu1 %v3286_v2  ;;  %v3331_v2 = vld [vmem:[%s3525_s22 + $0x90] sm:$0xff]  }
 0xb23   : > { %3173 = vmatpush3.bf16.msra.mxu0 %v3258_v50  ;;  %v3298_v50 = vld [vmem:[%s3520_s19 + $0x24] ss:$16 sps:$4 sm:$0xff]  }
 0xb24   : > { %3174 = vmatprep.subr.bf16.mxu0 %v3441_v36  ;;  %v1797_v36 = vsub.s32 3, %v3644_v11 }
 0xb25   : > { %2142 = vmatpush1.bf16.msra.mxu1 %v3284_v4  ;;  %v3333_v4 = vld [vmem:[%s3525_s22 + $0xc8] sm:$0xff]  }
 0xb26   : > { %v1798_v29 = vrot.slane %v3648_v13, %v1797_v36  ;;  %2143 = vmatprep.subr.bf16.mxu1 %v3292_v6  ;;  %v3335_v6 = vld [vmem:[%s3525_s22 + $0x88] sm:$0xff]  }
 0xb27   : > { %3175 = vmatpush3.bf16.msra.mxu0 %v3259_v15  ;;  %v3299_v15 = vld [vmem:[%s3520_s19 + $0x28] ss:$16 sps:$4 sm:$0xff]  }
 0xb28   : > { %2176 = vmatprep.subr.bf16.mxu0 %v3265_v47  ;;  %v3309_v47 = vld [vmem:[%s3525_s22 + $0xf8] sm:$0xff]  }
 0xb29   : > { %2144 = vmatpush1.bf16.msra.mxu1 %v3290_v8  ;;  %v3337_v8 = vld [vmem:[%s3525_s22 + $0xc0] sm:$0xff]  }
 0xb2a   : > { %2145 = vmatprep.subr.bf16.mxu1 %v3298_v50  ;;  %v3339_v50 = vld [vmem:[%s3525_s22 + $0x80] sm:$0xff]  }
 0xbca   : > { %v1711_v10 = vpop.f32.mrf.mxu0 }
 0xbcb   : > { %1767 = vrot.lane.b32.xlu0 %v1711_v10, %s3444_s16  ;;  %v3301_v10 = vld [vmem:[%s3520_s19 + $0x2c] ss:$16 sps:$4 sm:$0xff]  }
 0xbcc   : > { %v3152_v14 = vpop.f32.mrf.mxu0 }
 0xbcd   : > { %v3296_v14 = vld [vmem:[%s3520_s19 + $0x20] ss:$16 sps:$4 sm:$0xff]  }
 0xbce   : > { %v1714_v16 = vpop.f32.mrf.mxu0  ;;  %2146 = vmatpush1.bf16.msra.mxu1 %v3296_v14  ;;  %v560_v14 = vld [vmem:[%s3530_s25 + $0x18] sm:$0xff] }
 0xbcf   : > { %v3304_v16 = vld [vmem:[%s3520_s19 + $0x4] ss:$16 sps:$4 sm:$0xff]  }
 0xbd0   : > { %v3153_v18 = vpop.f32.mrf.mxu0  ;;  %2147 = vmatprep.subr.bf16.mxu1 %v3304_v16 }
 0xbd1   : > { %v3307_v18 = vld [vmem:[%s3520_s19 + $0xc] ss:$16 sps:$4 sm:$0xff]  }
 0xbd4   : > { %v1759_v19 = vpop.f32.mrf.mxu1 }
 0xbd5   : > { %1769 = vrot.lane.b32.xlu1 %v1759_v19, %s3444_s16  ;;  %v3302_v19 = vld [vmem:[%s3520_s19] ss:$16 sps:$4 sm:$0xff]  }
 0xbd6   : > { %v3158_v20 = vpop.f32.mrf.mxu1  ;;  %2148 = vmatpush1.bf16.msra.mxu1 %v3302_v19 }
 0xbd7   : > { %v3305_v20 = vld [vmem:[%s3520_s19 + $0x8] ss:$16 sps:$4 sm:$0xff]  }
 0xbd8   : > { %v1762_v21 = vpop.f32.mrf.mxu1 }
 0xbda   : > { %v3159_v22 = vpop.f32.mrf.mxu1 }
 0xc3d   : > { %v1768_v23 = vpop.permute.xlu0 %1767 }
 0xc3e   : > { %1774 = vst.msk [vmem:[#allocation2] sm:$0xff] %vm1773_vm6, %v1768_v23 }
 0xc45   : > { %v1776_v25 = vld [vmem:[#allocation2] sm:$0xff] }
 0xc47   : > { %v1770_v24 = vpop.permute.xlu1 %1769 }
 0xc48   : > { %1775 = vst.msk [vmem:[#allocation2 + $0x8] sm:$0xff] %vm1773_vm6, %v1770_v24 }
 0xc4f   : > { %v1777_v27 = vld [vmem:[#allocation2 + $0x8] sm:$0xff] }
 0xc50   : > { %v1778_v28 = vpack.c.bf16 %v1777_v27, %v1776_v25 }
 0xc52   : > { %3177 = vmatmul.mubr.bf16.vlgmr.msra.gmra.mxu0 %v1778_v28  ;;  %v1914_v28 = vsub.s32 4, %v3644_v11 }
 0xc53   : > { %2208 = vmatprep.mubr.bf16.mxu0 %v3442_v59  ;;  %2177 = vmatpush1.bf16.msra.mxu0 %v3263_v46  ;;  %v3308_v46 = vld [vmem:[%s3525_s22 + $0x78] sm:$0xff]  }
 0xc54   : > { %2178 = vmatprep.subr.bf16.mxu0 %v3271_v58  ;;  %3000 = vmatprep.subr.bf16.mxu1 %v3308_v46  ;;  %v3320_v58 = vld [vmem:[%s3525_s22 + $0x60] sm:$0xff]  }
 0xc57   : > { %2179 = vmatpush1.bf16.msra.mxu0 %v3269_v61  ;;  %v3322_v61 = vld [vmem:[%s3525_s22 + $0x20] sm:$0xff]  }
 0xc58   : > { %2180 = vmatprep.subr.bf16.mxu0 %v3277_v63  ;;  %v3324_v63 = vld [vmem:[%s3525_s22 + $0x58] sm:$0xff]  }
 0xc5b   : > { %2181 = vmatpush1.bf16.msra.mxu0 %v3275_v49  ;;  %v3326_v49 = vld [vmem:[%s3525_s22 + $0x18] sm:$0xff]  }
 0xc5c   : > { %2182 = vmatprep.subr.bf16.mxu0 %v3283_v55  ;;  %v3330_v55 = vld [vmem:[%s3525_s22 + $0x10] sm:$0xff]  }
 0xc5f   : > { %2183 = vmatpush1.bf16.msra.mxu0 %v3281_v1  ;;  %v3329_v1 = vld [vmem:[%s3525_s22 + $0xd0] sm:$0xff]  }
 0xc60   : > { %2184 = vmatprep.subr.bf16.mxu0 %v3289_v3  ;;  %v3332_v3 = vld [vmem:[%s3525_s22 + $0x48] sm:$0xff]  }
 0xc63   : > { %2185 = vmatpush1.bf16.msra.mxu0 %v3287_v5  ;;  %v3334_v5 = vld [vmem:[%s3525_s22 + $0x8] sm:$0xff]  }
 0xc64   : > { %2186 = vmatprep.subr.bf16.mxu0 %v3295_v7  ;;  %v3336_v7 = vld [vmem:[%s3525_s22 + $0x40] sm:$0xff]  }
 0xc67   : > { %2187 = vmatpush1.bf16.msra.mxu0 %v3293_v9  ;;  %v3338_v9 = vld [vmem:[%s3525_s22] sm:$0xff]  }
 0xc68   : > { %2188 = vmatprep.subr.bf16.mxu0 %v3301_v10  ;;  %v1959_v10 = vsub.s32 6, %v3644_v11 }
 0xc6b   : > { %2189 = vmatpush1.bf16.msra.mxu0 %v3299_v15  ;;  %v3942_v15 = vld [vmem:[%s3530_s25] sm:$0xff] }
 0xc6c   : > { %2190 = vmatprep.subr.bf16.mxu0 %v3307_v18  ;;  %v1960_v16 = vrot.slane %v3942_v15, %v1959_v10  ;;  %v3399_v18 = vld [vmem:[%s3530_s25 + $0x10] sm:$0xff] }
 0xc6d   : > { %v1968_v19 = vrot.slane %v3399_v18, %v1959_v10 }
 0xc6f   : > { %2191 = vmatpush1.bf16.msra.mxu0 %v3305_v20  ;;  %v3400_v20 = vld [vmem:[%s3530_s25 + $0x8] sm:$0xff] }
 0xc70   : > { %3022 = vmatprep.subr.bf16.mxu0 %v3309_v47 }
 0xd12   : > { %v1881_v31 = vpop.f32.mrf.mxu0 }
 0xd13   : > { %v1882_v32 = vadd.f32 %v1881_v31, %v1798_v29  ;;  %v1915_v31 = vrot.slane %v3648_v13, %v1914_v28 }
 0xd14   : > { %v3178_v34 = vpop.f32.mrf.mxu0 }
 0xd15   : > { %v3853_v37 = vadd.f32 %v3396_v35, %v1882_v32  ;;  %v1920_v32 = vsub.s32 5, %v3644_v11 }
 0xd16   : > { %v1884_v39 = vpop.f32.mrf.mxu0 }
 0xd17   : > { %v1885_v40 = vadd.f32 %v1884_v39, %v1798_v29  ;;  %1890 = vadd.xlane.f32.xlu0 %v3853_v37 }
 0xd18   : > { %v3179_v41 = vpop.f32.mrf.mxu0 }
 0xd19   : > { %v3856_v59 = vadd.f32 %v3397_v43, %v1885_v40  ;;  %v1921_v40 = vrot.slane %v3648_v13, %v1920_v32  ;;  %v3312_v13 = vld [vmem:[%s3525_s22 + $0x70] sm:$0xff]  }
 0xd1b   : > { %1892 = vadd.xlane.f32.xlu1 %v3856_v59 }
 0xda0   : > { %v1891_v48 = vpop.xlane.xlu0 %1890 }
 0xda1   : > { %v1894_v51 = vmul.f32 0.0078125, %v1891_v48  ;;  %v3310_v48 = vld [vmem:[%s3525_s22 + $0x38] sm:$0xff]  }
 0xda3   : > { %v3864_v52 = vsub.f32 %v3853_v37, %v1894_v51  ;;  %v3311_v51 = vld [vmem:[%s3525_s22 + $0xb8] sm:$0xff]  }
 0xda4   : > { %v1893_v53 = vpop.xlane.xlu1 %1892 }
 0xda5   : > { %v1895_v26 = vmul.f32 0.0078125, %v1893_v53  ;;  %v1898_v30 = vmul.f32 %v3864_v52, %v3864_v52  ;;  %v3314_v53 = vld [vmem:[%s3525_s22 + $0x30] sm:$0xff]  }
 0xda7   : > { %v3869_v38 = vsub.f32 %v3856_v59, %v1895_v26  ;;  %1900 = vadd.xlane.f32.xlu0 %v1898_v30  ;;  %v3315_v26 = vld [vmem:[%s3525_s22 + $0xb0] sm:$0xff]   ;;  %v3316_v30 = vld [vmem:[%s3525_s22 + $0x68] sm:$0xff]  }
 0xda9   : > { %v1899_v54 = vmul.f32 %v3869_v38, %v3869_v38 }
 0xdab   : > { %1902 = vadd.xlane.f32.xlu0 %v1899_v54  ;;  %v3318_v54 = vld [vmem:[%s3525_s22 + $0x28] sm:$0xff]  }
 0xe30   : > { %v1901_v21 = vpop.xlane.xlu0 %1900 }
 0xe31   : > { %v1904_v22 = vmul.f32 0.0078125, %v1901_v21  ;;  %v1964_v21 = vrot.slane %v3400_v20, %v1959_v10 }
 0xe33   : > { %v1906_v23 = vadd.f32 1e-06, %v1904_v22  ;;  %v1972_v22 = vrot.slane %v560_v14, %v1959_v10 }
 0xe34   : > { %v1903_v24 = vpop.xlane.xlu0 %1902 }
 0xe35   : > { %3376 = vrsqrt.f32 %v1906_v23  ;;  %v1905_v25 = vmul.f32 0.0078125, %v1903_v24 }
 0xe37   : > { %v1907_v27 = vadd.f32 1e-06, %v1905_v25 }
 0xe39   : > { %3378 = vrsqrt.f32 %v1907_v27 }
 0xe42   : > { %v3377_v36 = vpop.eup %3376 }
 0xe43   : > { %v1910_v29 = vmul.f32 %v3377_v36, %v3864_v52  ;;  %v3313_v52 = vld [vmem:[%s3525_s22 + $0xf0] sm:$0xff]  }
 0xe45   : > { %v1916_v39 = vmul.f32 %v1915_v31, %v1910_v29 }
 0xe46   : > { %v3379_v34 = vpop.eup %3378 }
 0xe47   : > { %v1911_v35 = vmul.f32 %v3379_v34, %v3869_v38  ;;  %v1922_v43 = vadd.f32 %v1921_v40, %v1916_v39  ;;  %v3317_v38 = vld [vmem:[%s3525_s22 + $0xe8] sm:$0xff]  }
 0xe49   : > { %v1917_v41 = vmul.f32 %v1915_v31, %v1911_v35 }
 0xe4b   : > { %v1923_v44 = vadd.f32 %v1921_v40, %v1917_v41 }
 0xe4d   : > { %v1924_v45 = vpack.c.bf16 %v1923_v44, %v1922_v43 }
 0xe4f   : > { %2166 = vmatmul.mubr.bf16.vlgmr.msra.gmra.mxu1 %v1924_v45  ;;  %2209 = vmatmul.mubr.bf16.vlgmr.msra.gmra.mxu0 %v1924_v45 }
 0xe50   : > { %3001 = vmatpush3.bf16.msra.mxu1 %v3310_v48  ;;  %3023 = vmatpush3.bf16.msra.mxu0 %v3311_v51 }
 0xe51   : > { %3002 = vmatprep.subr.bf16.mxu1 %v3312_v13  ;;  %3024 = vmatprep.subr.bf16.mxu0 %v3313_v52 }
 0xe54   : > { %3003 = vmatpush3.bf16.msra.mxu1 %v3314_v53  ;;  %3025 = vmatpush3.bf16.msra.mxu0 %v3315_v26 }
 0xe55   : > { %3004 = vmatprep.subr.bf16.mxu1 %v3316_v30  ;;  %3026 = vmatprep.subr.bf16.mxu0 %v3317_v38 }
 0xe58   : > { %3005 = vmatpush3.bf16.msra.mxu1 %v3318_v54  ;;  %3027 = vmatpush3.bf16.msra.mxu0 %v3319_v57 }
 0xe59   : > { %3006 = vmatprep.subr.bf16.mxu1 %v3320_v58  ;;  %3028 = vmatprep.subr.bf16.mxu0 %v3321_v60 }
 0xe5c   : > { %3007 = vmatpush3.bf16.msra.mxu1 %v3322_v61  ;;  %3029 = vmatpush3.bf16.msra.mxu0 %v3323_v62 }
 0xe5d   : > { %3008 = vmatprep.subr.bf16.mxu1 %v3324_v63  ;;  %3030 = vmatprep.subr.bf16.mxu0 %v3325_v42 }
 0xe60   : > { %3009 = vmatpush3.bf16.msra.mxu1 %v3326_v49  ;;  %3031 = vmatpush3.bf16.msra.mxu0 %v3327_v0 }
 0xe61   : > { %3010 = vmatprep.subr.bf16.mxu1 %v3328_v56  ;;  %3032 = vmatprep.subr.bf16.mxu0 %v3329_v1 }
 0xe64   : > { %3011 = vmatpush3.bf16.msra.mxu1 %v3330_v55  ;;  %3033 = vmatpush3.bf16.msra.mxu0 %v3331_v2 }
 0xe65   : > { %3012 = vmatprep.subr.bf16.mxu1 %v3332_v3  ;;  %3034 = vmatprep.subr.bf16.mxu0 %v3333_v4 }
 0xe68   : > { %3013 = vmatpush3.bf16.msra.mxu1 %v3334_v5  ;;  %3035 = vmatpush3.bf16.msra.mxu0 %v3335_v6 }
 0xe69   : > { %3014 = vmatprep.subr.bf16.mxu1 %v3336_v7  ;;  %3036 = vmatprep.subr.bf16.mxu0 %v3337_v8 }
 0xe6c   : > { %3015 = vmatpush3.bf16.msra.mxu1 %v3338_v9  ;;  %3037 = vmatpush3.bf16.msra.mxu0 %v3339_v50 }
 0xf0f   : > { %v2167_v23 = vpop.f32.mrf.mxu1  ;;  %v2210_v24 = vpop.f32.mrf.mxu0 }
 0xf10   : > { %v3947_v25 = vadd.f32 %v2167_v23, %v1960_v16  ;;  %v3949_v27 = vadd.f32 %v2210_v24, %v1968_v19 }
 0xf11   : > { %v2169_v28 = vpop.f32.mrf.mxu1  ;;  %v2212_v36 = vpop.f32.mrf.mxu0 }
 0xf12   : > { %v2227_v29 = vmul.f32 0.044715, %v3947_v25  ;;  %v2229_v31 = vmul.f32 0.044715, %v3949_v27  ;;  %v2170_v32 = vadd.f32 %v2169_v28, %v1964_v21  ;;  %v3953_v34 = vadd.f32 %v2212_v36, %v1972_v22 }
 0xf13   : > { %v2171_v35 = vpop.f32.mrf.mxu1  ;;  %v2214_v39 = vpop.f32.mrf.mxu0 }
 0xf14   : > { %v2235_v40 = vmul.f32 %v2227_v29, %v3947_v25  ;;  %v2237_v41 = vmul.f32 %v2229_v31, %v3949_v27  ;;  %v2228_v43 = vmul.f32 0.044715, %v2170_v32  ;;  %v2230_v44 = vmul.f32 0.044715, %v3953_v34 }
 0xf15   : > { %v2172_v45 = vadd.f32 %v2171_v35, %v1960_v16  ;;  %v3958_v46 = vadd.f32 %v2214_v39, %v1968_v19  ;;  %v2173_v47 = vpop.f32.mrf.mxu1  ;;  %v2216_v48 = vpop.f32.mrf.mxu0  ;;  %v2220_v31 = vmul.f32 0.5, %v2170_v32  ;;  %v2219_v39 = vmul.f32 0.5, %v3947_v25 }
 0xf16   : > { %v2243_v51 = vmul.f32 %v2235_v40, %v3947_v25  ;;  %v2245_v13 = vmul.f32 %v2237_v41, %v3949_v27  ;;  %v2236_v52 = vmul.f32 %v2228_v43, %v2170_v32  ;;  %v2238_v53 = vmul.f32 %v2230_v44, %v3953_v34 }
 0xf17   : > { %v2231_v26 = vmul.f32 0.044715, %v2172_v45  ;;  %v2233_v30 = vmul.f32 0.044715, %v3958_v46  ;;  %v2174_v38 = vadd.f32 %v2173_v47, %v1964_v21  ;;  %v2217_v54 = vadd.f32 %v2216_v48, %v1972_v22 }
 0xf18   : > { %v2251_v57 = vadd.f32 %v2243_v51, %v3947_v25  ;;  %v2253_v58 = vadd.f32 %v2245_v13, %v3949_v27  ;;  %v2244_v60 = vmul.f32 %v2236_v52, %v2170_v32  ;;  %v2246_v61 = vmul.f32 %v2238_v53, %v3953_v34 }
 0xf19   : > { %v2239_v62 = vmul.f32 %v2231_v26, %v2172_v45  ;;  %v2241_v63 = vmul.f32 %v2233_v30, %v3958_v46  ;;  %v2232_v42 = vmul.f32 0.044715, %v2174_v38  ;;  %v2234_v49 = vmul.f32 0.044715, %v2217_v54 }
 0xf1a   : > { %v2259_v0 = vmul.f32 0.7978846, %v2251_v57  ;;  %v2261_v56 = vmul.f32 0.7978846, %v2253_v58  ;;  %v2252_v1 = vadd.f32 %v2244_v60, %v2170_v32  ;;  %v2254_v6 = vadd.f32 %v2246_v61, %v3953_v34 }
 0xf1b   : > { %v2247_v55 = vmul.f32 %v2239_v62, %v2172_v45  ;;  %v2249_v2 = vmul.f32 %v2241_v63, %v3958_v46  ;;  %v2240_v3 = vmul.f32 %v2232_v42, %v2174_v38  ;;  %v2242_v4 = vmul.f32 %v2234_v49, %v2217_v54 }
 0xf1c   : > { %v2260_v5 = vmul.f32 0.7978846, %v2252_v1  ;;  %3380 = vtanh.f32 %v2259_v0  ;;  %v2262_v10 = vmul.f32 0.7978846, %v2254_v6  ;;  %v2223_v44 = vmul.f32 0.5, %v2172_v45 }
 0xf1d   : > { %v2255_v7 = vadd.f32 %v2247_v55, %v2172_v45  ;;  %v2257_v8 = vadd.f32 %v2249_v2, %v3958_v46  ;;  %v2248_v9 = vmul.f32 %v2240_v3, %v2174_v38  ;;  %3382 = vtanh.f32 %v2261_v56 }
 0xf1e   : > { %v2250_v50 = vmul.f32 %v2242_v4, %v2217_v54  ;;  %3384 = vtanh.f32 %v2260_v5  ;;  %v2224_v13 = vmul.f32 0.5, %v2174_v38  ;;  %v2225_v53 = vmul.f32 0.5, %v3958_v46 }
 0xf1f   : > { %v2263_v14 = vmul.f32 0.7978846, %v2255_v7  ;;  %v2265_v16 = vmul.f32 0.7978846, %v2257_v8  ;;  %v2256_v18 = vadd.f32 %v2248_v9, %v2174_v38  ;;  %3386 = vtanh.f32 %v2262_v10 }
 0xf20   : > { %v2258_v19 = vadd.f32 %v2250_v50, %v2217_v54  ;;  %v2222_v30 = vmul.f32 0.5, %v3953_v34  ;;  %v2226_v57 = vmul.f32 0.5, %v2217_v54  ;;  %v2221_v25 = vmul.f32 0.5, %v3949_v27 }
 0xf21   : > { %3388 = vtanh.f32 %v2263_v14  ;;  %v2264_v20 = vmul.f32 0.7978846, %v2256_v18  ;;  %v2361_v34 = vsub.s32 7, %v3644_v11 }
 0xf22   : > { %3390 = vtanh.f32 %v2265_v16  ;;  %v2266_v21 = vmul.f32 0.7978846, %v2258_v19 }
 0xf23   : > { %3392 = vtanh.f32 %v2264_v20  ;;  %v2362_v55 = vrot.slane %v3942_v15, %v2361_v34 }
 0xf24   : > { %3394 = vtanh.f32 %v2266_v21 }
 0xf29   : > { %v3381_v22 = vpop.eup %3380 }
 0xf2a   : > { %v3383_v23 = vpop.eup %3382  ;;  %v2275_v47 = vadd.f32 1.0, %v3381_v22 }
 0xf2b   : > { %v3385_v24 = vpop.eup %3384  ;;  %v2277_v26 = vadd.f32 1.0, %v3383_v23 }
 0xf2c   : > { %v3387_v28 = vpop.eup %3386  ;;  %v2276_v35 = vadd.f32 1.0, %v3385_v24  ;;  %v2283_v42 = vmul.f32 %v2275_v47, %v2219_v39 }
 0xf2d   : > { %v2278_v43 = vadd.f32 1.0, %v3387_v28  ;;  %v2285_v0 = vmul.f32 %v2277_v26, %v2221_v25 }
 0xf2e   : > { %v3389_v36 = vpop.eup %3388  ;;  %v2284_v60 = vmul.f32 %v2276_v35, %v2220_v31 }
 0xf2f   : > { %v3391_v29 = vpop.eup %3390  ;;  %v2279_v40 = vadd.f32 1.0, %v3389_v36  ;;  %v2286_v63 = vmul.f32 %v2278_v43, %v2222_v30 }
 0xf30   : > { %v3393_v41 = vpop.eup %3392  ;;  %v2281_v48 = vadd.f32 1.0, %v3391_v29 }
 0xf31   : > { %v3395_v51 = vpop.eup %3394  ;;  %v2280_v52 = vadd.f32 1.0, %v3393_v41  ;;  %v2287_v32 = vmul.f32 %v2279_v40, %v2223_v44 }
 0xf32   : > { %v2282_v58 = vadd.f32 1.0, %v3395_v51  ;;  %v2289_v62 = vmul.f32 %v2281_v48, %v2225_v53 }
 0xf33   : > { %v2288_v61 = vmul.f32 %v2280_v52, %v2224_v13  ;;  %v2291_v56 = vpack.c.bf16 %v2287_v32, %v2283_v42 }
 0xf34   : > { %v2290_v45 = vmul.f32 %v2282_v58, %v2226_v57  ;;  %v2293_v46 = vpack.c.bf16 %v2289_v62, %v2285_v0 }
 0xf35   : > { %v2292_v49 = vpack.c.bf16 %v2288_v61, %v2284_v60 }
 0xf36   : > { %v2294_v38 = vpack.c.bf16 %v2290_v45, %v2286_v63 }
 0xf37   : > { %2587 = vmatprep.mubr.bf16.mxu1 %v2292_v49 }
 0xf38   : > { %2628 = vmatprep.mubr.bf16.mxu0 %v2294_v38  ;;  %2588 = vmatmul.mubr.bf16.vlgmr.msra.gmra.mxu1 %v2291_v56 }
 0xf39   : > { %2629 = vmatmul.mubr.bf16.vlgmr.msra.gmra.mxu0 %v2293_v46 }
 0xff8   : > { %v3016_v54 = vpop.f32.mrf.mxu1 }
 0xff9   : > { %v3038_v1 = vpop.f32.mrf.mxu0 }
 0xffa   : > { %v3017_v27 = vpop.f32.mrf.mxu1 }
 0xffb   : > { %v3018_v2 = vadd.f32 %v3017_v27, %v3016_v54  ;;  %v3039_v3 = vpop.f32.mrf.mxu0 }
 0xffc   : > { %v3019_v4 = vpop.f32.mrf.mxu1  ;;  %v3040_v6 = vadd.f32 %v3039_v3, %v3038_v1 }
 0xffd   : > { %v2590_v5 = vadd.f32 %v3018_v2, %v2362_v55  ;;  %v3041_v7 = vpop.f32.mrf.mxu0 }
 0xffe   : > { %v3020_v8 = vpop.f32.mrf.mxu1 }
 0xfff   : > { %v2631_v9 = vadd.f32 %v3040_v6, %v2590_v5  ;;  %v3021_v50 = vadd.f32 %v3020_v8, %v3019_v4  ;;  %v3042_v10 = vpop.f32.mrf.mxu0 }
0x1000   : > { %v3043_v18 = vadd.f32 %v3042_v10, %v3041_v7 }
0x1001   : > { %v2637_v14 = vadd.f32 %v2631_v9, %v3853_v37  ;;  %v2593_v16 = vadd.f32 %v3021_v50, %v2362_v55 }
0x1003   : > { %2639 = vst [vmem:[#allocation3] sm:$0xff] %v2637_v14  ;;  %v2634_v19 = vadd.f32 %v3043_v18, %v2593_v16  ;;  %2644 = sbr.rel (%p2919_p5) target bundleno = 4415 (0x113f), region = 60 }
0x1005   : > { %v2638_v20 = vadd.f32 %v2634_v19, %v3856_v59 }
0x1007   : > { %2640 = vst [vmem:[#allocation3 + $0x8] sm:$0xff] %v2638_v20 }
0x1008   : > { %2645 = vadd.xlane.f32.xlu0 %v2637_v14  ;;  %v2670_v41 = vrot.slane %v3597_v33, %v589_v12  ;;  %v2676_v47 = vrot.slane %v3597_v33, %v595_v17 }
0x100c   : > { %2647 = vadd.xlane.f32.xlu0 %v2638_v20 }
0x1091   : > { %v2646_v15 = vpop.xlane.xlu0 %2645 }
0x1092   : > { %v2649_v21 = vmul.f32 0.0078125, %v2646_v15 }
0x1094   : > { %v2651_v22 = vsub.f32 %v2637_v14, %v2649_v21 }
0x1095   : > { %v2648_v23 = vpop.xlane.xlu0 %2647 }
0x1096   : > { %v2650_v24 = vmul.f32 0.0078125, %v2648_v23  ;;  %v2653_v28 = vmul.f32 %v2651_v22, %v2651_v22 }
0x1098   : > { %v2652_v36 = vsub.f32 %v2638_v20, %v2650_v24  ;;  %2655 = vadd.xlane.f32.xlu1 %v2653_v28 }
0x109a   : > { %v2654_v37 = vmul.f32 %v2652_v36, %v2652_v36 }
0x109c   : > { %2657 = vadd.xlane.f32.xlu1 %v2654_v37 }
0x1121   : > { %v2656_v29 = vpop.xlane.xlu1 %2655 }
0x1122   : > { %v2659_v31 = vmul.f32 0.0078125, %v2656_v29 }
0x1124   : > { %v2661_v35 = vadd.f32 1e-06, %v2659_v31 }
0x1125   : > { %v2658_v59 = vpop.xlane.xlu1 %2657 }
0x1126   : > { %3401 = vrsqrt.f32 %v2661_v35  ;;  %v2660_v39 = vmul.f32 0.0078125, %v2658_v59 }
0x1128   : > { %v2662_v40 = vadd.f32 1e-06, %v2660_v39 }
0x112a   : > { %3403 = vrsqrt.f32 %v2662_v40 }
0x1133   : > { %v3402_v43 = vpop.eup %3401 }
0x1134   : > { %v2665_v44 = vmul.f32 %v3402_v43, %v2651_v22 }
0x1136   : > { %v2671_v48 = vmul.f32 %v2670_v41, %v2665_v44 }
0x1137   : > { %v3404_v51 = vpop.eup %3403 }
0x1138   : > { %v2677_v13 = vadd.f32 %v2676_v47, %v2671_v48  ;;  %v2666_v52 = vmul.f32 %v3404_v51, %v2652_v36 }
0x113a   : > { %2679 = vst [vmem:[#allocation3] sm:$0xff] %v2677_v13  ;;  %v2672_v53 = vmul.f32 %v2670_v41, %v2666_v52 }
0x113c   : > { %v2678_v26 = vadd.f32 %v2676_v47, %v2672_v53 }
0x113e   : > { %2680 = vst [vmem:[#allocation3 + $0x8] sm:$0xff] %v2678_v26 }
0x113f PF: > { %p3185_p6 = scmp.eq.s32.totalorder %s3501_s28, 1  ;;  %s3447_s12 = smov [#allocation3]  }
0x1140   : > { %s2687_s19 = sshll.u32 %s3447_s12, 4  ;;  %s2688_s19 = int_to_ptr.vmem [resolvable:$true] %s2687_s19 }
0x1141   : > { %s3405_s22 = scalar_lea.vmem %s2688_s19, 256  ;;  %p3412_p10 = scmp.lt.s32.totalorder %s2688_s19, %s2688_s19 }
0x1142   : > { %p3406_p7 = scmp.ne.s32.totalorder %s2688_s19, %s3405_s22  ;;  %p3413_p11 = scmp.lt.s32.totalorder %s3405_s22, %s3405_s22 }
0x1144   : > { %p3407_p8 = pnand %p3406_p7, %p3185_p6  ;;  %p3414_p12 = por %p3413_p11, %p3412_p10 }
0x1146   : > { %p3408_p9 = pneg %p3407_p8 }
0x1148   : > { %p3415_p13 = pnand %p3414_p12, %p3408_p9 }
0x114a   : > { %3418 = shalt.err (!%p3415_p13)
}
0x114b   : > { %s3448_s25 = smov 128   ;;  %s3449_s24 = smov 8  }
0x114c   : > { %3182 = dma.vmem_to_hbm [thread:$0]  (%p3185_p6), %s2688_s19, 256, %s4009_s8, [#allocation4], %s3448_s25, %s3448_s25, %s3449_s24  }
0x114d   : > { %3434 = dma.done.wait (%p3185_p6), [#allocation4], 256  }
0x114e   : > { %3436 = vsyncadd (%p3185_p6), [#allocation4], 4294967040 }
0x114f PF: > { %s19_s27 = sadd.s32 1, %s3439_s27  }
0x1150   : > { %p16_p0 = scmp.ge.s32.totalorder %s19_s27, 4  }
0x1152   :  { %18 = sbr.rel (!%p16_p0) target bundleno = 1 (0x1), region = 99 }
0x1157   :  { %2703 = vsyncpa [#allocation4], 1 }
0x1158   :  { %2705 = vsyncpa [#allocation4 + $0x1], 1 }

</bundles_post_ra>
